<compile_context>
chip_gen: v7x
topology: tpu7x:2x2x1
jax: 0.10.0
libtpu: 0.0.40
codegen_flags: <defaults>
</compile_context>

<pallas_src>
import functools

import jax
import jax.numpy as jnp
from jax.experimental import pallas as pl
from jax.experimental.pallas import tpu as pltpu


# ----------------------------- in-kernel helpers -----------------------------

def _layer_norm(x, g, b, eps=1e-5):
    mu = jnp.mean(x, axis=-1, keepdims=True)
    var = jnp.mean((x - mu) ** 2, axis=-1, keepdims=True)
    return (x - mu) * jax.lax.rsqrt(var + eps) * g + b


# ------------------------------- Pallas kernel --------------------------------

def encoder_layer_kernel(xq_ref, xhq_ref, xhkv_ref, mask_ref,
                         wq_ref, wkv_ref, wo_ref, bo_ref,
                         g1_ref, b1_ref,
                         wf1_ref, bf1_ref, wf2_ref, bf2_ref,
                         g2_ref, b2_ref,
                         out_ref, *, heads, head_dim, scale):
    f32, bf16 = jnp.float32, jnp.bfloat16

    xq = xq_ref[0]          # (tq, E)  f32 — residual / FFN layout
    xh_q = xhq_ref[0]       # (H, tq, hd) f32 — head-split query tile
    xh_kv = xhkv_ref[0]     # (H, Sk, hd) f32 — head-split full-sequence K/V source
    tq = xq.shape[0]
    sk = xh_kv.shape[1]
    emb = heads * head_dim

    # Additive mask bias, computed once per tile (hoisted out of all head work).
    # Equivalent to PyTorch masked_fill(-1e20) followed by /sqrt(emb): masked
    # logits underflow to exactly 0 after softmax either way.
    bias = jnp.where(mask_ref[0] == 0, f32(-1e20), f32(0.0))       # (1, Sk)

    # ---- shared per-head projections: one Q matmul + one fused K/V matmul ----
    # (bf16 MXU operands, f32 accumulation; 1/sqrt(emb) folded into Q once)
    q2 = jnp.dot(xh_q.reshape(heads * tq, head_dim).astype(bf16), wq_ref[...],
                 preferred_element_type=f32) * scale                # (H*tq, hd)
    kv2 = jnp.dot(xh_kv.reshape(heads * sk, head_dim).astype(bf16), wkv_ref[...],
                  preferred_element_type=f32)                       # (H*Sk, 2*hd)
    q = q2.reshape(heads, tq, head_dim)
    kv = kv2.reshape(heads, sk, 2 * head_dim)
    k = kv[:, :, :head_dim]
    v = kv[:, :, head_dim:]

    # ---- attention, batched over the head axis (flash-style einsums) ----
    e = jnp.einsum('hqd,hkd->hqk', q.astype(bf16), k.astype(bf16),
                   preferred_element_type=f32) + bias               # (H, tq, Sk)
    p = jax.nn.softmax(e, axis=-1)                                  # f32
    o = jnp.einsum('hqk,hkd->hqd', p.astype(bf16), v.astype(bf16),
                   preferred_element_type=f32)                      # (H, tq, hd)

    # fc_out: the (E, E) contraction split along heads (same FLOPs, avoids a
    # relayout back to (tq, E)); wo_ref holds the weight pre-reshaped to (H, hd, E).
    attn = jnp.zeros((tq, emb), f32)
    for h in range(heads):
        attn = attn + jnp.dot(o[h].astype(bf16), wo_ref[h],
                              preferred_element_type=f32)
    attn = attn + bo_ref[...]

    x1 = _layer_norm(attn + xq, g1_ref[...], b1_ref[...])

    # ---- feed-forward (bf16 operands, f32 accumulation) ----
    hid = jnp.maximum(
        jnp.dot(x1.astype(bf16), wf1_ref[...], preferred_element_type=f32)
        + bf1_ref[...], 0.0)
    ff = jnp.dot(hid.astype(bf16), wf2_ref[...], preferred_element_type=f32) + bf2_ref[...]

    out_ref[0] = _layer_norm(ff + x1, g2_ref[...], b2_ref[...]).astype(out_ref.dtype)


# ------------------------------ pallas_call glue ------------------------------

def build_layer_call(N, S, E, heads, tq, layer_params):
    hd = E // heads
    nq = S // tq
    scale = 1.0 / float(E) ** 0.5

    w_specs = [pl.BlockSpec(p.shape, lambda n, q, z=(0,) * p.ndim: z)
               for p in layer_params]
    in_specs = [
        pl.BlockSpec((1, tq, E), lambda n, q: (n, q, 0)),              # x (residual/FFN)
        pl.BlockSpec((1, heads, tq, hd), lambda n, q: (n, 0, q, 0)),   # head-split queries
        pl.BlockSpec((1, heads, S, hd), lambda n, q: (n, 0, 0, 0)),    # head-split K/V
        pl.BlockSpec((1, 1, S), lambda n, q: (n, 0, 0)),               # int32 padding mask
    ] + w_specs

    # VMEM budget from the actual block footprint (double-buffered activations +
    # resident weights), capped below the smallest physical VMEM (v7x: 64 MiB).
    w_bytes = sum(int(p.size) * p.dtype.itemsize for p in layer_params)
    act_bytes = 4 * (2 * tq * E + heads * tq * hd + heads * S * hd + S)
    vmem_limit = int(min(max(2 * (w_bytes + 2 * act_bytes), 32 * 1024 * 1024),
                         60 * 1024 * 1024))

    return pl.pallas_call(
        functools.partial(encoder_layer_kernel, heads=heads, head_dim=hd, scale=scale),
        grid=(N, nq),
        in_specs=in_specs,
        out_specs=pl.BlockSpec((1, tq, E), lambda n, q: (n, q, 0)),
        out_shape=jax.ShapeDtypeStruct((N, S, E), jnp.float32),
        compiler_params=pltpu.CompilerParams(
            dimension_semantics=("parallel", "parallel"),
            vmem_limit_bytes=vmem_limit),
    )


def encoder_forward(tokens, mask, params, emb, heads, tq=None):
    N, S = tokens.shape
    hd = emb // heads
    if tq is None:
        tq = 256 if S % 256 == 0 else S
    assert S % tq == 0

    # Embedding lookups are gather glue, kept in plain JAX (dropout = identity).
    x = params["word_emb"][tokens] + params["pos_emb"][jnp.arange(S)][None, :, :]

    layer_fn = build_layer_call(N, S, emb, heads, tq, params["layers"][0])
    for lp in params["layers"]:
        # Head split done wrapper-side (layout plumbing, not in-kernel relayout).
        xh = x.reshape(N, S, heads, hd).transpose(0, 2, 1, 3)  # (N, H, S, hd)
        x = layer_fn(x, xh, xh, mask, *lp)
    # TODO(synk): could fuse all layers into one pallas_call with a layer grid axis
    # (weight streaming) to avoid per-layer HBM round-trips of the activation.
    return x


# ------------------------------ parameter setup -------------------------------

def init_params(key, vocab, max_len, emb, heads, expansion, num_layers):
    hd = emb // heads
    ks = jax.random.split(key, 2 + num_layers)

    def lin_w(k, fin, fout):
        # Pre-transposed Linear weight (fin, fout) so the kernel computes x @ W;
        # stored in bf16 (MXU-native, halves weight DMA / VMEM).
        return (jax.random.normal(k, (fin, fout), jnp.float32)
                / jnp.sqrt(jnp.float32(fin))).astype(jnp.bfloat16)

    params = {
        "word_emb": jax.random.normal(ks[0], (vocab, emb), jnp.float32),
        "pos_emb": jax.random.normal(ks[1], (max_len, emb), jnp.float32),
    }
    layers = []
    for i in range(num_layers):
        lk = jax.random.split(ks[2 + i], 12)
        wq = lin_w(lk[0], hd, hd)                                    # shared per-head Q
        wkv = jnp.concatenate([lin_w(lk[1], hd, hd),                 # fused K|V (hd, 2hd)
                               lin_w(lk[2], hd, hd)], axis=1)
        wo = lin_w(lk[3], emb, emb).reshape(heads, hd, emb)          # fc_out, per-head split
        bo = 0.1 * jax.random.normal(lk[4], (1, emb), jnp.float32)
        g1 = 1.0 + 0.1 * jax.random.normal(lk[5], (1, emb), jnp.float32)
        b1 = 0.1 * jax.random.normal(lk[6], (1, emb), jnp.float32)
        wf1 = lin_w(lk[7], emb, emb * expansion)
        bf1 = 0.1 * jax.random.normal(lk[8], (1, emb * expansion), jnp.float32)
        wf2 = lin_w(lk[9], emb * expansion, emb)
        bf2 = 0.1 * jax.random.normal(lk[10], (1, emb), jnp.float32)
        g2 = 1.0 + 0.1 * jax.random.normal(lk[11], (1, emb), jnp.float32)
        b2 = jnp.zeros((1, emb), jnp.float32)
        layers.append((wq, wkv, wo, bo, g1, b1, wf1, bf1, wf2, bf2, g2, b2))
    params["layers"] = layers
    return params


# ------------------------------ pure-JAX reference -----------------------------

def _r(a):
    # Round to bf16 values and back: mirrors the kernel's bf16 MXU operands.
    return a.astype(jnp.bfloat16).astype(jnp.float32)


def _ref_ln(x, g, b, eps=1e-5):
    mu = jnp.mean(x, -1, keepdims=True)
    var = jnp.mean((x - mu) ** 2, -1, keepdims=True)
    return (x - mu) * jax.lax.rsqrt(var + eps) * g + b


def encoder_forward_ref(tokens, mask, params, emb, heads):
    N, S = tokens.shape
    hd = emb // heads
    scale = 1.0 / float(emb) ** 0.5
    x = params["word_emb"][tokens] + params["pos_emb"][jnp.arange(S)][None, :, :]
    m4 = mask[:, None, :, :]                      # (N, 1, 1, S)
    for (wq, wkv, wo3, bo, g1, b1, wf1, bf1, wf2, bf2, g2, b2) in params["layers"]:
        wq32 = wq.astype(jnp.float32)
        wk32, wv32 = jnp.split(wkv.astype(jnp.float32), 2, axis=1)
        wo32 = wo3.astype(jnp.float32).reshape(emb, emb)
        wf1_32, wf2_32 = wf1.astype(jnp.float32), wf2.astype(jnp.float32)

        xh = _r(x).reshape(N, S, heads, hd)
        q = jnp.einsum('nshd,de->nshe', xh, wq32,
                       preferred_element_type=jnp.float32) * scale
        k = jnp.einsum('nshd,de->nshe', xh, wk32, preferred_element_type=jnp.float32)
        v = jnp.einsum('nshd,de->nshe', xh, wv32, preferred_element_type=jnp.float32)
        e = jnp.einsum('nqhd,nkhd->nhqk', _r(q), _r(k),
                       preferred_element_type=jnp.float32)
        # masked_fill(-1e20); the /sqrt(emb) scale is folded into q (equivalent
        # after softmax since masked logits underflow to probability 0 either way).
        e = jnp.where(m4 == 0, jnp.float32(-1e20), e)
        p = jax.nn.softmax(e, axis=3)
        o = jnp.einsum('nhqk,nkhd->nqhd', _r(p), _r(v),
                       preferred_element_type=jnp.float32).reshape(N, S, emb)
        attn = jnp.einsum('nse,ef->nsf', _r(o), wo32,
                          preferred_element_type=jnp.float32) + bo
        x1 = _ref_ln(attn + x, g1, b1)
        hid = jnp.maximum(
            jnp.einsum('nse,ef->nsf', _r(x1), wf1_32,
                       preferred_element_type=jnp.float32) + bf1, 0.0)
        ff = jnp.einsum('nsf,fe->nse', _r(hid), wf2_32,
                        preferred_element_type=jnp.float32) + bf2
        x = _ref_ln(ff + x1, g2, b2)
    return x


# ------------------------------------ main -------------------------------------

if __name__ == "__main__":
    N, S = 2, 8
    VOCAB, MAX_LEN, EMB, HEADS, EXP, LAYERS = 50, 16, 128, 4, 4, 2

    key = jax.random.PRNGKey(0)
    k_tok, k_par = jax.random.split(key, 2)

    tokens = jax.random.randint(k_tok, (N, S), 0, VOCAB, dtype=jnp.int32)
    # int32 padding mask (N, 1, S): last two key positions of batch 1 are padding.
    mask = jnp.ones((N, 1, S), jnp.int32).at[1, 0, S - 2:].set(0)

    params = init_params(k_par, VOCAB, MAX_LEN, EMB, HEADS, EXP, LAYERS)

    out = encoder_forward(tokens, mask, params, EMB, HEADS)
    out = jax.block_until_ready(out)

    ref = encoder_forward_ref(tokens, mask, params, EMB, HEADS)
    assert out.shape == (N, S, EMB)
    assert jnp.allclose(out, ref, rtol=2e-2, atol=2e-2), \
        f"max abs diff = {float(jnp.max(jnp.abs(out - ref)))}"

    print("KERNEL_OK")
</pallas_src>

<mosaic_0001>
module attributes {stable_mosaic.version = 11 : i64} {
  func.func @encoder_layer_kernel(%arg0: i32, %arg1: i32, %arg2: memref<1x8x128xf32, #tpu.memory_space<vmem>>, %arg3: memref<1x4x8x32xf32, #tpu.memory_space<vmem>>, %arg4: memref<1x4x8x32xf32, #tpu.memory_space<vmem>>, %arg5: memref<1x1x8xi32, #tpu.memory_space<vmem>>, %arg6: memref<32x32xbf16, #tpu.memory_space<vmem>>, %arg7: memref<32x64xbf16, #tpu.memory_space<vmem>>, %arg8: memref<4x32x128xbf16, #tpu.memory_space<vmem>>, %arg9: memref<1x128xf32, #tpu.memory_space<vmem>>, %arg10: memref<1x128xf32, #tpu.memory_space<vmem>>, %arg11: memref<1x128xf32, #tpu.memory_space<vmem>>, %arg12: memref<128x512xbf16, #tpu.memory_space<vmem>>, %arg13: memref<1x512xf32, #tpu.memory_space<vmem>>, %arg14: memref<512x128xbf16, #tpu.memory_space<vmem>>, %arg15: memref<1x128xf32, #tpu.memory_space<vmem>>, %arg16: memref<1x128xf32, #tpu.memory_space<vmem>>, %arg17: memref<1x128xf32, #tpu.memory_space<vmem>>, %arg18: memref<1x8x128xf32, #tpu.memory_space<vmem>>) attributes {dimension_semantics = [#tpu.dimension_semantics<parallel>, #tpu.dimension_semantics<parallel>], iteration_bounds = array<i64: 2, 1>, scalar_prefetch = 0 : i64, scratch_operands = 0 : i64, tpu.core_type = #tpu.core_type<tc>, window_params = [{transform_indices = @transform_0, window_bounds = array<i64: 1, 8, 128>}, {transform_indices = @transform_1, window_bounds = array<i64: 1, 4, 8, 32>}, {transform_indices = @transform_2, window_bounds = array<i64: 1, 4, 8, 32>}, {transform_indices = @transform_3, window_bounds = array<i64: 1, 1, 8>}, {pipeline_mode = #tpu.pipeline_mode<synchronous>, transform_indices = @transform_4, window_bounds = array<i64: 32, 32>}, {pipeline_mode = #tpu.pipeline_mode<synchronous>, transform_indices = @transform_5, window_bounds = array<i64: 32, 64>}, {pipeline_mode = #tpu.pipeline_mode<synchronous>, transform_indices = @transform_6, window_bounds = array<i64: 4, 32, 128>}, {pipeline_mode = #tpu.pipeline_mode<synchronous>, transform_indices = @transform_7, window_bounds = array<i64: 1, 128>}, {pipeline_mode = #tpu.pipeline_mode<synchronous>, transform_indices = @transform_8, window_bounds = array<i64: 1, 128>}, {pipeline_mode = #tpu.pipeline_mode<synchronous>, transform_indices = @transform_9, window_bounds = array<i64: 1, 128>}, {pipeline_mode = #tpu.pipeline_mode<synchronous>, transform_indices = @transform_10, window_bounds = array<i64: 128, 512>}, {pipeline_mode = #tpu.pipeline_mode<synchronous>, transform_indices = @transform_11, window_bounds = array<i64: 1, 512>}, {pipeline_mode = #tpu.pipeline_mode<synchronous>, transform_indices = @transform_12, window_bounds = array<i64: 512, 128>}, {pipeline_mode = #tpu.pipeline_mode<synchronous>, transform_indices = @transform_13, window_bounds = array<i64: 1, 128>}, {pipeline_mode = #tpu.pipeline_mode<synchronous>, transform_indices = @transform_14, window_bounds = array<i64: 1, 128>}, {pipeline_mode = #tpu.pipeline_mode<synchronous>, transform_indices = @transform_15, window_bounds = array<i64: 1, 128>}, {transform_indices = @transform_16, window_bounds = array<i64: 1, 8, 128>}]} {
    %c0 = arith.constant 0 : index
    %c0_0 = arith.constant 0 : index
    %c0_1 = arith.constant 0 : index
    %0 = vector.load %arg2[%c0, %c0_0, %c0_1] : memref<1x8x128xf32, #tpu.memory_space<vmem>>, vector<1x8x128xf32>
    %1 = vector.shape_cast %0 : vector<1x8x128xf32> to vector<8x128xf32>
    %c0_2 = arith.constant 0 : index
    %c0_3 = arith.constant 0 : index
    %c0_4 = arith.constant 0 : index
    %c0_5 = arith.constant 0 : index
    %2 = vector.load %arg3[%c0_2, %c0_3, %c0_4, %c0_5] : memref<1x4x8x32xf32, #tpu.memory_space<vmem>>, vector<1x4x8x32xf32>
    %3 = vector.shape_cast %2 : vector<1x4x8x32xf32> to vector<4x8x32xf32>
    %c0_6 = arith.constant 0 : index
    %c0_7 = arith.constant 0 : index
    %c0_8 = arith.constant 0 : index
    %c0_9 = arith.constant 0 : index
    %4 = vector.load %arg4[%c0_6, %c0_7, %c0_8, %c0_9] : memref<1x4x8x32xf32, #tpu.memory_space<vmem>>, vector<1x4x8x32xf32>
    %5 = vector.shape_cast %4 : vector<1x4x8x32xf32> to vector<4x8x32xf32>
    %c0_10 = arith.constant 0 : index
    %c0_11 = arith.constant 0 : index
    %c0_12 = arith.constant 0 : index
    %6 = vector.load %arg5[%c0_10, %c0_11, %c0_12] : memref<1x1x8xi32, #tpu.memory_space<vmem>>, vector<1x1x8xi32>
    %7 = vector.shape_cast %6 : vector<1x1x8xi32> to vector<1x8xi32>
    %c0_i32 = arith.constant 0 : i32
    %8 = vector.broadcast %c0_i32 : i32 to vector<1x8xi32>
    %9 = arith.cmpi eq, %7, %8 : vector<1x8xi32>
    %cst = arith.constant -1.000000e+20 : f32
    %cst_13 = arith.constant 0.000000e+00 : f32
    %10 = vector.broadcast %cst : f32 to vector<1x8xf32>
    %11 = vector.broadcast %cst_13 : f32 to vector<1x8xf32>
    %12 = arith.select %9, %10, %11 : vector<1x8xi1>, vector<1x8xf32>
    %13 = vector.shape_cast %3 : vector<4x8x32xf32> to vector<32x32xf32>
    %14 = arith.truncf %13 : vector<32x32xf32> to vector<32x32xbf16>
    %c0_14 = arith.constant 0 : index
    %c0_15 = arith.constant 0 : index
    %15 = vector.load %arg6[%c0_14, %c0_15] : memref<32x32xbf16, #tpu.memory_space<vmem>>, vector<32x32xbf16>
    %cst_16 = arith.constant dense<0.000000e+00> : vector<32x32xf32>
    %16 = tpu.matmul %14, %15, %cst_16 {dimension_numbers = #tpu.dot_dimension_numbers<[1], [0], [0], [1], [0, 0, 1, 1], [], []>} : vector<32x32xbf16>, vector<32x32xbf16>, vector<32x32xf32> -> vector<32x32xf32>
    %cst_17 = arith.constant 0.0883883461 : f32
    %17 = vector.broadcast %cst_17 : f32 to vector<32x32xf32>
    %18 = arith.mulf %16, %17 : vector<32x32xf32>
    %19 = vector.shape_cast %5 : vector<4x8x32xf32> to vector<32x32xf32>
    %20 = arith.truncf %19 : vector<32x32xf32> to vector<32x32xbf16>
    %c0_18 = arith.constant 0 : index
    %c0_19 = arith.constant 0 : index
    %21 = vector.load %arg7[%c0_18, %c0_19] : memref<32x64xbf16, #tpu.memory_space<vmem>>, vector<32x64xbf16>
    %cst_20 = arith.constant dense<0.000000e+00> : vector<32x64xf32>
    %22 = tpu.matmul %20, %21, %cst_20 {dimension_numbers = #tpu.dot_dimension_numbers<[1], [0], [0], [1], [0, 0, 1, 1], [], []>} : vector<32x32xbf16>, vector<32x64xbf16>, vector<32x64xf32> -> vector<32x64xf32>
    %23 = vector.shape_cast %18 : vector<32x32xf32> to vector<4x8x32xf32>
    %24 = vector.shape_cast %22 : vector<32x64xf32> to vector<4x8x64xf32>
    %25 = vector.extract_strided_slice %24 {offsets = [0, 0, 0], sizes = [4, 8, 32], strides = [1, 1, 1]} : vector<4x8x64xf32> to vector<4x8x32xf32>
    %26 = vector.extract_strided_slice %24 {offsets = [0, 0, 32], sizes = [4, 8, 32], strides = [1, 1, 1]} : vector<4x8x64xf32> to vector<4x8x32xf32>
    %27 = arith.truncf %23 : vector<4x8x32xf32> to vector<4x8x32xbf16>
    %28 = arith.truncf %25 : vector<4x8x32xf32> to vector<4x8x32xbf16>
    "tpu.trace_start"() <{level = 10 : i32, message = "hqd,hkd->hqk"}> : () -> ()
    %cst_21 = arith.constant dense<0.000000e+00> : vector<4x8x8xf32>
    %29 = tpu.matmul %27, %28, %cst_21 {dimension_numbers = #tpu.dot_dimension_numbers<[2], [2], [1], [1], [0, 0, 0, 1, 1, 1], [0], [0]>} : vector<4x8x32xbf16>, vector<4x8x32xbf16>, vector<4x8x8xf32> -> vector<4x8x8xf32>
    "tpu.trace_stop"() : () -> ()
    %30 = vector.shape_cast %12 : vector<1x8xf32> to vector<1x1x8xf32>
    %31 = vector.broadcast %30 : vector<1x1x8xf32> to vector<4x8x8xf32>
    %32 = arith.addf %29, %31 : vector<4x8x8xf32>
    %cst_22 = arith.constant dense<0xFF800000> : vector<4x8xf32>
    %33 = vector.multi_reduction <maximumf>, %32, %cst_22 [2] : vector<4x8x8xf32> to vector<4x8xf32>
    %cst_23 = arith.constant 0xFF800000 : f32
    %34 = vector.broadcast %cst_23 : f32 to vector<4x8xf32>
    %35 = arith.maximumf %34, %33 : vector<4x8xf32>
    %36 = vector.shape_cast %35 : vector<4x8xf32> to vector<4x8x1xf32>
    %37 = vector.broadcast %36 : vector<4x8x1xf32> to vector<4x8x8xf32>
    %38 = arith.subf %32, %37 : vector<4x8x8xf32>
    %39 = math.exp %38 : vector<4x8x8xf32>
    %cst_24 = arith.constant dense<0.000000e+00> : vector<4x8xf32>
    %40 = vector.multi_reduction <add>, %39, %cst_24 [2] : vector<4x8x8xf32> to vector<4x8xf32>
    %41 = vector.shape_cast %40 : vector<4x8xf32> to vector<4x8x1xf32>
    %42 = vector.broadcast %41 : vector<4x8x1xf32> to vector<4x8x8xf32>
    %43 = arith.divf %39, %42 : vector<4x8x8xf32>
    %44 = arith.truncf %43 : vector<4x8x8xf32> to vector<4x8x8xbf16>
    %45 = arith.truncf %26 : vector<4x8x32xf32> to vector<4x8x32xbf16>
    "tpu.trace_start"() <{level = 10 : i32, message = "hqk,hkd->hqd"}> : () -> ()
    %cst_25 = arith.constant dense<0.000000e+00> : vector<4x8x32xf32>
    %46 = tpu.matmul %44, %45, %cst_25 {dimension_numbers = #tpu.dot_dimension_numbers<[2], [1], [1], [2], [0, 0, 0, 1, 1, 2], [0], [0]>} : vector<4x8x8xbf16>, vector<4x8x32xbf16>, vector<4x8x32xf32> -> vector<4x8x32xf32>
    %cst_26 = arith.constant 0.000000e+00 : f32
    "tpu.trace_stop"() : () -> ()
    %47 = vector.broadcast %cst_26 : f32 to vector<8x128xf32>
    %48 = vector.extract_strided_slice %46 {offsets = [0, 0, 0], sizes = [1, 8, 32], strides = [1, 1, 1]} : vector<4x8x32xf32> to vector<1x8x32xf32>
    %49 = vector.shape_cast %48 : vector<1x8x32xf32> to vector<8x32xf32>
    %50 = arith.truncf %49 : vector<8x32xf32> to vector<8x32xbf16>
    %c0_27 = arith.constant 0 : index
    %c0_28 = arith.constant 0 : index
    %c0_29 = arith.constant 0 : index
    %51 = vector.load %arg8[%c0_27, %c0_28, %c0_29] : memref<4x32x128xbf16, #tpu.memory_space<vmem>>, vector<1x32x128xbf16>
    %52 = vector.shape_cast %51 : vector<1x32x128xbf16> to vector<32x128xbf16>
    %cst_30 = arith.constant dense<0.000000e+00> : vector<8x128xf32>
    %53 = tpu.matmul %50, %52, %cst_30 {dimension_numbers = #tpu.dot_dimension_numbers<[1], [0], [0], [1], [0, 0, 1, 1], [], []>} : vector<8x32xbf16>, vector<32x128xbf16>, vector<8x128xf32> -> vector<8x128xf32>
    %54 = arith.addf %47, %53 : vector<8x128xf32>
    %55 = vector.extract_strided_slice %46 {offsets = [1, 0, 0], sizes = [1, 8, 32], strides = [1, 1, 1]} : vector<4x8x32xf32> to vector<1x8x32xf32>
    %56 = vector.shape_cast %55 : vector<1x8x32xf32> to vector<8x32xf32>
    %57 = arith.truncf %56 : vector<8x32xf32> to vector<8x32xbf16>
    %c1 = arith.constant 1 : index
    %c0_31 = arith.constant 0 : index
    %c0_32 = arith.constant 0 : index
    %58 = vector.load %arg8[%c1, %c0_31, %c0_32] : memref<4x32x128xbf16, #tpu.memory_space<vmem>>, vector<1x32x128xbf16>
    %59 = vector.shape_cast %58 : vector<1x32x128xbf16> to vector<32x128xbf16>
    %cst_33 = arith.constant dense<0.000000e+00> : vector<8x128xf32>
    %60 = tpu.matmul %57, %59, %cst_33 {dimension_numbers = #tpu.dot_dimension_numbers<[1], [0], [0], [1], [0, 0, 1, 1], [], []>} : vector<8x32xbf16>, vector<32x128xbf16>, vector<8x128xf32> -> vector<8x128xf32>
    %61 = arith.addf %54, %60 : vector<8x128xf32>
    %62 = vector.extract_strided_slice %46 {offsets = [2, 0, 0], sizes = [1, 8, 32], strides = [1, 1, 1]} : vector<4x8x32xf32> to vector<1x8x32xf32>
    %63 = vector.shape_cast %62 : vector<1x8x32xf32> to vector<8x32xf32>
    %64 = arith.truncf %63 : vector<8x32xf32> to vector<8x32xbf16>
    %c2 = arith.constant 2 : index
    %c0_34 = arith.constant 0 : index
    %c0_35 = arith.constant 0 : index
    %65 = vector.load %arg8[%c2, %c0_34, %c0_35] : memref<4x32x128xbf16, #tpu.memory_space<vmem>>, vector<1x32x128xbf16>
    %66 = vector.shape_cast %65 : vector<1x32x128xbf16> to vector<32x128xbf16>
    %cst_36 = arith.constant dense<0.000000e+00> : vector<8x128xf32>
    %67 = tpu.matmul %64, %66, %cst_36 {dimension_numbers = #tpu.dot_dimension_numbers<[1], [0], [0], [1], [0, 0, 1, 1], [], []>} : vector<8x32xbf16>, vector<32x128xbf16>, vector<8x128xf32> -> vector<8x128xf32>
    %68 = arith.addf %61, %67 : vector<8x128xf32>
    %69 = vector.extract_strided_slice %46 {offsets = [3, 0, 0], sizes = [1, 8, 32], strides = [1, 1, 1]} : vector<4x8x32xf32> to vector<1x8x32xf32>
    %70 = vector.shape_cast %69 : vector<1x8x32xf32> to vector<8x32xf32>
    %71 = arith.truncf %70 : vector<8x32xf32> to vector<8x32xbf16>
    %c3 = arith.constant 3 : index
    %c0_37 = arith.constant 0 : index
    %c0_38 = arith.constant 0 : index
    %72 = vector.load %arg8[%c3, %c0_37, %c0_38] : memref<4x32x128xbf16, #tpu.memory_space<vmem>>, vector<1x32x128xbf16>
    %73 = vector.shape_cast %72 : vector<1x32x128xbf16> to vector<32x128xbf16>
    %cst_39 = arith.constant dense<0.000000e+00> : vector<8x128xf32>
    %74 = tpu.matmul %71, %73, %cst_39 {dimension_numbers = #tpu.dot_dimension_numbers<[1], [0], [0], [1], [0, 0, 1, 1], [], []>} : vector<8x32xbf16>, vector<32x128xbf16>, vector<8x128xf32> -> vector<8x128xf32>
    %75 = arith.addf %68, %74 : vector<8x128xf32>
    %c0_40 = arith.constant 0 : index
    %c0_41 = arith.constant 0 : index
    %76 = vector.load %arg9[%c0_40, %c0_41] : memref<1x128xf32, #tpu.memory_space<vmem>>, vector<1x128xf32>
    %77 = vector.broadcast %76 : vector<1x128xf32> to vector<8x128xf32>
    %78 = arith.addf %75, %77 : vector<8x128xf32>
    %79 = arith.addf %78, %1 : vector<8x128xf32>
    %c0_42 = arith.constant 0 : index
    %c0_43 = arith.constant 0 : index
    %80 = vector.load %arg10[%c0_42, %c0_43] : memref<1x128xf32, #tpu.memory_space<vmem>>, vector<1x128xf32>
    %c0_44 = arith.constant 0 : index
    %c0_45 = arith.constant 0 : index
    %81 = vector.load %arg11[%c0_44, %c0_45] : memref<1x128xf32, #tpu.memory_space<vmem>>, vector<1x128xf32>
    %cst_46 = arith.constant dense<0.000000e+00> : vector<8xf32>
    %82 = vector.multi_reduction <add>, %79, %cst_46 [1] : vector<8x128xf32> to vector<8xf32>
    %83 = vector.shape_cast %82 : vector<8xf32> to vector<8x1xf32>
    %cst_47 = arith.constant 1.280000e+02 : f32
    %84 = vector.broadcast %cst_47 : f32 to vector<8x1xf32>
    %85 = arith.divf %83, %84 : vector<8x1xf32>
    %86 = vector.broadcast %85 : vector<8x1xf32> to vector<8x128xf32>
    %87 = arith.subf %79, %86 : vector<8x128xf32>
    %88 = arith.mulf %87, %87 : vector<8x128xf32>
    %cst_48 = arith.constant dense<0.000000e+00> : vector<8xf32>
    %89 = vector.multi_reduction <add>, %88, %cst_48 [1] : vector<8x128xf32> to vector<8xf32>
    %90 = vector.shape_cast %89 : vector<8xf32> to vector<8x1xf32>
    %cst_49 = arith.constant 1.280000e+02 : f32
    %91 = vector.broadcast %cst_49 : f32 to vector<8x1xf32>
    %92 = arith.divf %90, %91 : vector<8x1xf32>
    %93 = vector.broadcast %85 : vector<8x1xf32> to vector<8x128xf32>
    %94 = arith.subf %79, %93 : vector<8x128xf32>
    %cst_50 = arith.constant 9.99999974E-6 : f32
    %95 = vector.broadcast %cst_50 : f32 to vector<8x1xf32>
    %96 = arith.addf %92, %95 : vector<8x1xf32>
    %97 = math.rsqrt %96 : vector<8x1xf32>
    %98 = vector.broadcast %97 : vector<8x1xf32> to vector<8x128xf32>
    %99 = arith.mulf %94, %98 : vector<8x128xf32>
    %100 = vector.broadcast %80 : vector<1x128xf32> to vector<8x128xf32>
    %101 = arith.mulf %99, %100 : vector<8x128xf32>
    %102 = vector.broadcast %81 : vector<1x128xf32> to vector<8x128xf32>
    %103 = arith.addf %101, %102 : vector<8x128xf32>
    %104 = arith.truncf %103 : vector<8x128xf32> to vector<8x128xbf16>
    %c0_51 = arith.constant 0 : index
    %c0_52 = arith.constant 0 : index
    %105 = vector.load %arg12[%c0_51, %c0_52] : memref<128x512xbf16, #tpu.memory_space<vmem>>, vector<128x512xbf16>
    %cst_53 = arith.constant dense<0.000000e+00> : vector<8x512xf32>
    %106 = tpu.matmul %104, %105, %cst_53 {dimension_numbers = #tpu.dot_dimension_numbers<[1], [0], [0], [1], [0, 0, 1, 1], [], []>} : vector<8x128xbf16>, vector<128x512xbf16>, vector<8x512xf32> -> vector<8x512xf32>
    %c0_54 = arith.constant 0 : index
    %c0_55 = arith.constant 0 : index
    %107 = vector.load %arg13[%c0_54, %c0_55] : memref<1x512xf32, #tpu.memory_space<vmem>>, vector<1x512xf32>
    %108 = vector.broadcast %107 : vector<1x512xf32> to vector<8x512xf32>
    %109 = arith.addf %106, %108 : vector<8x512xf32>
    %cst_56 = arith.constant 0.000000e+00 : f32
    %110 = vector.broadcast %cst_56 : f32 to vector<8x512xf32>
    %111 = arith.maximumf %109, %110 : vector<8x512xf32>
    %112 = arith.truncf %111 : vector<8x512xf32> to vector<8x512xbf16>
    %c0_57 = arith.constant 0 : index
    %c0_58 = arith.constant 0 : index
    %113 = vector.load %arg14[%c0_57, %c0_58] : memref<512x128xbf16, #tpu.memory_space<vmem>>, vector<512x128xbf16>
    %cst_59 = arith.constant dense<0.000000e+00> : vector<8x128xf32>
    %114 = tpu.matmul %112, %113, %cst_59 {dimension_numbers = #tpu.dot_dimension_numbers<[1], [0], [0], [1], [0, 0, 1, 1], [], []>} : vector<8x512xbf16>, vector<512x128xbf16>, vector<8x128xf32> -> vector<8x128xf32>
    %c0_60 = arith.constant 0 : index
    %c0_61 = arith.constant 0 : index
    %115 = vector.load %arg15[%c0_60, %c0_61] : memref<1x128xf32, #tpu.memory_space<vmem>>, vector<1x128xf32>
    %116 = vector.broadcast %115 : vector<1x128xf32> to vector<8x128xf32>
    %117 = arith.addf %114, %116 : vector<8x128xf32>
    %118 = arith.addf %117, %103 : vector<8x128xf32>
    %c0_62 = arith.constant 0 : index
    %c0_63 = arith.constant 0 : index
    %119 = vector.load %arg16[%c0_62, %c0_63] : memref<1x128xf32, #tpu.memory_space<vmem>>, vector<1x128xf32>
    %c0_64 = arith.constant 0 : index
    %c0_65 = arith.constant 0 : index
    %120 = vector.load %arg17[%c0_64, %c0_65] : memref<1x128xf32, #tpu.memory_space<vmem>>, vector<1x128xf32>
    %cst_66 = arith.constant dense<0.000000e+00> : vector<8xf32>
    %121 = vector.multi_reduction <add>, %118, %cst_66 [1] : vector<8x128xf32> to vector<8xf32>
    %122 = vector.shape_cast %121 : vector<8xf32> to vector<8x1xf32>
    %cst_67 = arith.constant 1.280000e+02 : f32
    %123 = vector.broadcast %cst_67 : f32 to vector<8x1xf32>
    %124 = arith.divf %122, %123 : vector<8x1xf32>
    %125 = vector.broadcast %124 : vector<8x1xf32> to vector<8x128xf32>
    %126 = arith.subf %118, %125 : vector<8x128xf32>
    %127 = arith.mulf %126, %126 : vector<8x128xf32>
    %cst_68 = arith.constant dense<0.000000e+00> : vector<8xf32>
    %128 = vector.multi_reduction <add>, %127, %cst_68 [1] : vector<8x128xf32> to vector<8xf32>
    %129 = vector.shape_cast %128 : vector<8xf32> to vector<8x1xf32>
    %cst_69 = arith.constant 1.280000e+02 : f32
    %130 = vector.broadcast %cst_69 : f32 to vector<8x1xf32>
    %131 = arith.divf %129, %130 : vector<8x1xf32>
    %132 = vector.broadcast %124 : vector<8x1xf32> to vector<8x128xf32>
    %133 = arith.subf %118, %132 : vector<8x128xf32>
    %cst_70 = arith.constant 9.99999974E-6 : f32
    %134 = vector.broadcast %cst_70 : f32 to vector<8x1xf32>
    %135 = arith.addf %131, %134 : vector<8x1xf32>
    %136 = math.rsqrt %135 : vector<8x1xf32>
    %137 = vector.broadcast %136 : vector<8x1xf32> to vector<8x128xf32>
    %138 = arith.mulf %133, %137 : vector<8x128xf32>
    %139 = vector.broadcast %119 : vector<1x128xf32> to vector<8x128xf32>
    %140 = arith.mulf %138, %139 : vector<8x128xf32>
    %141 = vector.broadcast %120 : vector<1x128xf32> to vector<8x128xf32>
    %142 = arith.addf %140, %141 : vector<8x128xf32>
    %c0_71 = arith.constant 0 : index
    %c0_72 = arith.constant 0 : index
    %c0_73 = arith.constant 0 : index
    %143 = vector.load %arg18[%c0_71, %c0_72, %c0_73] : memref<1x8x128xf32, #tpu.memory_space<vmem>>, vector<1x8x128xf32>
    %144 = vector.shape_cast %143 : vector<1x8x128xf32> to vector<8x128xf32>
    %145 = vector.shape_cast %142 : vector<8x128xf32> to vector<1x8x128xf32>
    tpu.vector_store %arg18[%c0_71, %c0_72, %c0_73], %145 {strides = array<i32>} : memref<1x8x128xf32, #tpu.memory_space<vmem>>, vector<1x8x128xf32>,
    return
  }
  func.func @transform_0(%arg0: i32, %arg1: i32) -> (i32, i32, i32) {
    %c0_i32 = arith.constant 0 : i32
    %c0_i32_0 = arith.constant 0 : i32
    return %arg0, %arg1, %c0_i32 : i32, i32, i32
  }
  func.func @transform_1(%arg0: i32, %arg1: i32) -> (i32, i32, i32, i32) {
    %c0_i32 = arith.constant 0 : i32
    %c0_i32_0 = arith.constant 0 : i32
    %c0_i32_1 = arith.constant 0 : i32
    return %arg0, %c0_i32, %arg1, %c0_i32_0 : i32, i32, i32, i32
  }
  func.func @transform_2(%arg0: i32, %arg1: i32) -> (i32, i32, i32, i32) {
    %c0_i32 = arith.constant 0 : i32
    %c0_i32_0 = arith.constant 0 : i32
    %c0_i32_1 = arith.constant 0 : i32
    %c0_i32_2 = arith.constant 0 : i32
    return %arg0, %c0_i32, %c0_i32_0, %c0_i32_1 : i32, i32, i32, i32
  }
  func.func @transform_3(%arg0: i32, %arg1: i32) -> (i32, i32, i32) {
    %c0_i32 = arith.constant 0 : i32
    %c0_i32_0 = arith.constant 0 : i32
    %c0_i32_1 = arith.constant 0 : i32
    return %arg0, %c0_i32, %c0_i32_0 : i32, i32, i32
  }
  func.func @transform_4(%arg0: i32, %arg1: i32) -> (i32, i32) {
    %c0_i32 = arith.constant 0 : i32
    %c0_i32_0 = arith.constant 0 : i32
    %c0_i32_1 = arith.constant 0 : i32
    return %c0_i32, %c0_i32_0 : i32, i32
  }
  func.func @transform_5(%arg0: i32, %arg1: i32) -> (i32, i32) {
    %c0_i32 = arith.constant 0 : i32
    %c0_i32_0 = arith.constant 0 : i32
    %c0_i32_1 = arith.constant 0 : i32
    return %c0_i32, %c0_i32_0 : i32, i32
  }
  func.func @transform_6(%arg0: i32, %arg1: i32) -> (i32, i32, i32) {
    %c0_i32 = arith.constant 0 : i32
    %c0_i32_0 = arith.constant 0 : i32
    %c0_i32_1 = arith.constant 0 : i32
    %c0_i32_2 = arith.constant 0 : i32
    return %c0_i32, %c0_i32_0, %c0_i32_1 : i32, i32, i32
  }
  func.func @transform_7(%arg0: i32, %arg1: i32) -> (i32, i32) {
    %c0_i32 = arith.constant 0 : i32
    %c0_i32_0 = arith.constant 0 : i32
    %c0_i32_1 = arith.constant 0 : i32
    return %c0_i32, %c0_i32_0 : i32, i32
  }
  func.func @transform_8(%arg0: i32, %arg1: i32) -> (i32, i32) {
    %c0_i32 = arith.constant 0 : i32
    %c0_i32_0 = arith.constant 0 : i32
    %c0_i32_1 = arith.constant 0 : i32
    return %c0_i32, %c0_i32_0 : i32, i32
  }
  func.func @transform_9(%arg0: i32, %arg1: i32) -> (i32, i32) {
    %c0_i32 = arith.constant 0 : i32
    %c0_i32_0 = arith.constant 0 : i32
    %c0_i32_1 = arith.constant 0 : i32
    return %c0_i32, %c0_i32_0 : i32, i32
  }
  func.func @transform_10(%arg0: i32, %arg1: i32) -> (i32, i32) {
    %c0_i32 = arith.constant 0 : i32
    %c0_i32_0 = arith.constant 0 : i32
    %c0_i32_1 = arith.constant 0 : i32
    return %c0_i32, %c0_i32_0 : i32, i32
  }
  func.func @transform_11(%arg0: i32, %arg1: i32) -> (i32, i32) {
    %c0_i32 = arith.constant 0 : i32
    %c0_i32_0 = arith.constant 0 : i32
    %c0_i32_1 = arith.constant 0 : i32
    return %c0_i32, %c0_i32_0 : i32, i32
  }
  func.func @transform_12(%arg0: i32, %arg1: i32) -> (i32, i32) {
    %c0_i32 = arith.constant 0 : i32
    %c0_i32_0 = arith.constant 0 : i32
    %c0_i32_1 = arith.constant 0 : i32
    return %c0_i32, %c0_i32_0 : i32, i32
  }
  func.func @transform_13(%arg0: i32, %arg1: i32) -> (i32, i32) {
    %c0_i32 = arith.constant 0 : i32
    %c0_i32_0 = arith.constant 0 : i32
    %c0_i32_1 = arith.constant 0 : i32
    return %c0_i32, %c0_i32_0 : i32, i32
  }
  func.func @transform_14(%arg0: i32, %arg1: i32) -> (i32, i32) {
    %c0_i32 = arith.constant 0 : i32
    %c0_i32_0 = arith.constant 0 : i32
    %c0_i32_1 = arith.constant 0 : i32
    return %c0_i32, %c0_i32_0 : i32, i32
  }
  func.func @transform_15(%arg0: i32, %arg1: i32) -> (i32, i32) {
    %c0_i32 = arith.constant 0 : i32
    %c0_i32_0 = arith.constant 0 : i32
    %c0_i32_1 = arith.constant 0 : i32
    return %c0_i32, %c0_i32_0 : i32, i32
  }
  func.func @transform_16(%arg0: i32, %arg1: i32) -> (i32, i32, i32) {
    %c0_i32 = arith.constant 0 : i32
    %c0_i32_0 = arith.constant 0 : i32
    return %arg0, %arg1, %c0_i32 : i32, i32, i32
  }
}

</mosaic_0001>

<bundles_post_ra>
// kernel: tpu_custom_call.1
= control target key start
LH: loop header
LB: loop body
LE: loop exit
PB: predicated region body
PF: predicated region fallthrough
CT: control target
= control target key end

     0   :  { %s3925_s0 = inlined_call_operand.hbm [shape: f32[2,8,128], index: 0, kind: input, shape index: {}]   ;;  %s3926_s1 = inlined_call_operand.hbm [shape: f32[2,4,8,32], index: 1, kind: input, shape index: {}]   ;;  %s3927_s2 = inlined_call_operand.hbm [shape: f32[2,4,8,32], index: 2, kind: input, shape index: {}]   ;;  %s3928_s3 = inlined_call_operand.vmem [shape: s32[2,1,8], index: 3, kind: input, shape index: {}]   ;;  %s3929_s4 = inlined_call_operand.hbm [shape: bf16[32,32], index: 4, kind: input, shape index: {}]   ;;  %s3930_s5 = inlined_call_operand.vmem [shape: bf16[32,64], index: 5, kind: input, shape index: {}]   ;;  %s3931_s6 = inlined_call_operand.hbm [shape: bf16[4,32,128], index: 6, kind: input, shape index: {}]   ;;  %s3932_s7 = inlined_call_operand.vmem [shape: f32[1,128], index: 7, kind: input, shape index: {}]   ;;  %s3933_s8 = inlined_call_operand.vmem [shape: f32[1,128], index: 8, kind: input, shape index: {}]   ;;  %s3934_s9 = inlined_call_operand.vmem [shape: f32[1,128], index: 9, kind: input, shape index: {}]   ;;  %s3935_s10 = inlined_call_operand.hbm [shape: bf16[128,512], index: 10, kind: input, shape index: {}]   ;;  %s3936_s11 = inlined_call_operand.vmem [shape: f32[1,512], index: 11, kind: input, shape index: {}]   ;;  %s3937_s12 = inlined_call_operand.hbm [shape: bf16[512,128], index: 12, kind: input, shape index: {}]   ;;  %s3938_s13 = inlined_call_operand.vmem [shape: f32[1,128], index: 13, kind: input, shape index: {}]   ;;  %s3939_s14 = inlined_call_operand.vmem [shape: f32[1,128], index: 14, kind: input, shape index: {}]   ;;  %s3940_s15 = inlined_call_operand.vmem [shape: f32[1,128], index: 15, kind: input, shape index: {}]   ;;  %s3941_s16 = inlined_call_operand.hbm [shape: f32[2,8,128], index: 16, kind: output, shape index: {}]  }
   0x1   :  { %3973 = sst [smem:[#allocation28_spill]] %s3925_s0 }
   0x2   :  { %3974 = sst [smem:[#allocation29_spill]] %s3926_s1 }
   0x3   :  { %3975 = sst [smem:[#allocation30_spill]] %s3928_s3 }
   0x4   :  { %3976 = sst [smem:[#allocation31_spill]] %s3929_s4 }
   0x5   :  { %3977 = sst [smem:[#allocation32_spill]] %s3930_s5 }
   0x6   :  { %3978 = sst [smem:[#allocation33_spill]] %s3932_s7 }
   0x7   :  { %3979 = sst [smem:[#allocation34_spill]] %s3933_s8 }
   0x8   :  { %3980 = sst [smem:[#allocation35_spill]] %s3934_s9 }
   0x9   :  { %3981 = sst [smem:[#allocation36_spill]] %s3935_s10 }
   0xa   :  { %3982 = sst [smem:[#allocation37_spill]] %s3936_s11 }
   0xb   :  { %3983 = sst [smem:[#allocation38_spill]] %s3938_s13 }
   0xc   :  { %3984 = sst [smem:[#allocation39_spill]] %s3939_s14 }
   0xd   :  { %3985 = sst [smem:[#allocation40_spill]] %s3940_s15 }
   0xe   :  { %3986 = sst [smem:[#allocation41_spill]] %s3941_s16 }
   0xf   :  { %21 = vsyncpa [#allocation3], 0 }
  0x10   :  { %23 = vsyncpa [#allocation3 + $0x1], 0 }
  0x11   :  { %24 = vsyncpa [#allocation6], 0 }
  0x12   :  { %26 = vsyncpa [#allocation6 + $0x1], 0 }
  0x13   :  { %27 = vsyncpa [#allocation9], 0 }
  0x14   :  { %28 = vsyncpa [#allocation12], 0 }
  0x15   :  { %29 = vsyncpa [#allocation4], 0 }
  0x16   :  { %31 = vsyncpa [#allocation4 + $0x1], 0  ;;  %s3401_s21 = smov 0   ;;  %s3403_s22 = smov 0  }
  0x17   :  { %s3405_s23 = smov 0   ;;  %s3407_s24 = smov 0  }
  0x18   :  { %s3409_s25 = smov 0   ;;  %s3411_s26 = smov 0  }
  0x19 LB: > { %3987 = sst [smem:[#allocation20_spill]] %s3276_s21  ;;  %s3432_s27 = sadd.s32 4294967295, %s3296_s26   ;;  %s3296_s26 = sphi %s3411_s26, %s37_s26   ;;  %s3292_s25 = sphi %s3409_s25, %s4048_s25   ;;  %s3288_s24 = sphi %s3407_s24, %s4047_s24   ;;  %s3284_s23 = sphi %s3405_s23, %s4046_s23   ;;  %s3280_s22 = sphi %s3403_s22, %s4045_s22   ;;  %s3276_s21 = sphi %s3401_s21, %s4044_s21  }
  0x1a   : > { %3988 = sst [smem:[#allocation21_spill]] %s3284_s23  ;;  %s2461_s28 = sadd.s32 4294967294, %s3296_s26  }
  0x1b   : > { %3989 = sst [smem:[#allocation22_spill]] %s3288_s24  ;;  %p71_p0 = scmp.ne.s32.totalorder %s3280_s22, %s3276_s21 }
  0x1c   : > { %3990 = sst [smem:[#allocation23_spill]] %s3296_s26  ;;  %p3946_p1 = scmp.eq.s32.totalorder %s3432_s27, 0 }
  0x1d   : > { %p435_p3 = scmp.eq.s32.totalorder %s2461_s28, 1  ;;  %p2462_p5 = scmp.ge.s32.totalorder %s3296_s26, 1 }
  0x1e   : > { %p3441_p4 = por %p3946_p1, %p71_p0  ;;  %p442_p7 = scmp.lt.s32.totalorder %s3296_s26, 3 }
  0x1f   : > { %p3446_p6 = por %p435_p3, %p71_p0  ;;  %s3298_s17 = smov [#allocation8]  }
  0x20   : > { %s3991_s29 = scalar_select %p3441_p4, 1, 0 }
  0x21   : > { %s3992_s30 = scalar_select %p3446_p6, 1, 0 }
  0x22   : > { %p3451_p8 = pnand %p2462_p5, %p442_p7  ;;  %s454_s18 = sshll.u32 %s3298_s17, 4  ;;  %s3455_s18 = int_to_ptr.vmem [resolvable:$true] %s454_s18 }
  0x23   : > { %3993 = sst [smem:[#allocation24_spill]] %s3992_s30  ;;  %s3299_s20 = smov [#allocation11]  }
  0x24   : > { %s3994_s0 = scalar_select %p3451_p8, 1, 0 }
  0x25   : > { %p2789_p9 = pneg %p3451_p8  ;;  %s492_s28 = sshll.u32 %s3299_s20, 4  ;;  %s3466_s28 = int_to_ptr.vmem [resolvable:$true] %s492_s28 }
  0x26   : > { %s3996_s4 = sld [smem:[#allocation31_spill]] }
  0x27   : > { %p3462_p11 = pnand %p2789_p9, %p3946_p1 }
  0x29   : > { %s3995_s19 = scalar_select %p3462_p11, 1, 0 }
  0x2a   : > { %p3476_p13 = pneg %p3462_p11 }
  0x2c   : > { %s3000_s16 = scalar_lea.hbm %s3996_s4, 256 }
  0x2d   : > { %p3001_p12 = scmp.ne.s32.totalorder %s3996_s4, %s3000_s16  ;;  %p3007_p5 = scmp.lt.u32.totalorder %s3000_s16, %s3996_s4 }
  0x2e   : > { %s3997_s14 = scalar_select %p3476_p13, 1, 0 }
  0x2f   : > { %p3003_p0 = pnand %p3476_p13, %p3001_p12 }
  0x31   : > { %p3004_p3 = pneg %p3003_p0 }
  0x33   : > { %p3009_p7 = pnand %p3007_p5, %p3004_p3 }
  0x35   : > { %3012 = shalt.err (!%p3009_p7)
}
  0x36   : > { %s3013_s15 = scalar_lea.vmem %s3455_s18, 256  ;;  %p3021_p2 = scmp.lt.s32.totalorder %s3455_s18, %s3455_s18 }
  0x37   : > { %p3014_p9 = scmp.ne.s32.totalorder %s3455_s18, %s3013_s15  ;;  %p3022_p6 = scmp.lt.s32.totalorder %s3013_s15, %s3013_s15 }
  0x39   : > { %p3016_p10 = pnand %p3014_p9, %p3476_p13  ;;  %p3023_p12 = por %p3022_p6, %p3021_p2 }
  0x3b   : > { %p3017_p1 = pneg %p3016_p10 }
  0x3d   : > { %p3024_p0 = pnand %p3023_p12, %p3017_p1 }
  0x3f   : > { %3027 = shalt.err (!%p3024_p0)
}
  0x40   : > { %s3947_s21 = smov 64   ;;  %s3949_s13 = smov 4  }
  0x41   : > { %2792 = dma.hbm_to_vmem [thread:$0]  (!%p3462_p11), %s3996_s4, 256, %s3455_s18, [#allocation9], %s3947_s21, %s3947_s21, %s3949_s13  }
  0x42   : > { %s3998_s10 = sld [smem:[#allocation36_spill]] }
  0x48   : > { %s3028_s15 = scalar_lea.hbm %s3998_s10, 4096 }
  0x49   : > { %p3029_p1 = scmp.ne.s32.totalorder %s3998_s10, %s3028_s15  ;;  %p3035_p10 = scmp.lt.u32.totalorder %s3028_s15, %s3998_s10 }
  0x4b   : > { %p3031_p2 = pnand %p3029_p1, %p3476_p13 }
  0x4d   : > { %p3032_p6 = pneg %p3031_p2 }
  0x4f   : > { %p3037_p3 = pnand %p3035_p10, %p3032_p6 }
  0x51   : > { %3040 = shalt.err (!%p3037_p3)
}
  0x52   : > { %s3041_s18 = scalar_lea.vmem %s3466_s28, 4096  ;;  %p3049_p12 = scmp.lt.s32.totalorder %s3466_s28, %s3466_s28 }
  0x53   : > { %p3042_p5 = scmp.ne.s32.totalorder %s3466_s28, %s3041_s18  ;;  %p3050_p0 = scmp.lt.s32.totalorder %s3041_s18, %s3041_s18 }
  0x55   : > { %p3044_p7 = pnand %p3042_p5, %p3476_p13  ;;  %p3051_p1 = por %p3050_p0, %p3049_p12 }
  0x57   : > { %p3045_p9 = pneg %p3044_p7 }
  0x59   : > { %p3052_p2 = pnand %p3051_p1, %p3045_p9 }
  0x5b   : > { %3055 = shalt.err (!%p3052_p2)
}
  0x5c   : > { %s3302_s9 = smov 256   ;;  %s3303_s7 = smov 16  }
  0x5d   : > { %2798 = dma.hbm_to_vmem [thread:$0]  (!%p3462_p11), %s3998_s10, 4096, %s3466_s28, [#allocation12], %s3302_s9, %s3302_s9, %s3303_s7  }
  0x5e   : > { %s49_s16 = sadd.s32 1, %s3292_s25  ;;  %s58_s30 = sadd.s32 1, %s3284_s23 }
  0x5f   : > { %p51_p6 = scmp.ge.s32.totalorder %s49_s16, 2  ;;  %p65_p10 = scmp.ne.s32.totalorder %s3284_s23, %s3280_s22 }
  0x60   : > { %p66_p3 = scmp.eq.s32.totalorder %s3296_s26, 0  ;;  %p2820_p5 = scmp.lt.s32.totalorder %s3296_s26, 2 }
  0x61   : > { %s4050_s16 = smov (%p51_p6, %s49_s16), 0  ;;  %p4000_p9 = scmp.eq.s32.totalorder %s3432_s27, 1 }
  0x62   : > { %3999 = sst [smem:[#allocation25_spill]] %s4050_s16  ;;  %p67_p7 = por %p66_p3, %p65_p10 }
  0x63   : > { %p3533_p12 = por %p4000_p9, %p65_p10  ;;  %s53_s20 = ssub.s32 %s3292_s25, %s4050_s16 }
  0x64   : > { %s3540_s28 = sand.u32 1, %s3284_s23   ;;  %p56_p0 = scmp.eq.s32.totalorder %s53_s20, 0 }
  0x65   : > { %s4001_s17 = scalar_select %p3533_p12, 1, 0 }
  0x66   : > { %p3542_p1 = pnand %p2820_p5, %p67_p7  ;;  %s550_s18 = sand.u32 1, %s3296_s26  }
  0x67   : > { %4002 = sst [smem:[#allocation26_spill]] %s4001_s17  ;;  %s3952_s9 = sshll.u32 %s3540_s28, 5 }
  0x68   : > { %s4003_s15 = scalar_select %p3542_p1, 1, 0 }
  0x69   : > { %s3549_s7 = scalar_select %p56_p0, %s3284_s23, %s58_s30  }
  0x6a   : > { %s3953_s8 = sshll.u32 %s3292_s25, 9  ;;  %s4005_s1 = sld [smem:[#allocation29_spill]] }
  0x6b   : > { %4004 = sst [smem:[#allocation27_spill]] %s3549_s7  ;;  %s554_s20 = scalar_lea.vmem [#allocation5], %s3952_s9 }
  0x6c   : > { %s562_s4 = sshll.u32 %s554_s20, 4  ;;  %s3563_s10 = scalar_lea.sflag [#allocation6], %s550_s18  ;;  %s3561_s4 = int_to_ptr.vmem [resolvable:$true] %s562_s4 }
  0x6d   : > { %p3569_p6 = pneg %p3542_p1 }
  0x6f   : > { %s4006_s16 = scalar_select %p3569_p6, 1, 0 }
  0x70   : > { %s3557_s13 = scalar_lea.hbm %s4005_s1, %s3953_s8  ;;  %s3061_s9 = scalar_lea.hbm %s4005_s1, 1024 }
  0x71   : > { %s3056_s30 = scalar_lea.hbm %s3557_s13, 512  ;;  %p3062_p5 = scmp.lt.u32.totalorder %s3557_s13, %s4005_s1 }
  0x72   : > { %p3057_p2 = scmp.ne.s32.totalorder %s3557_s13, %s3056_s30  ;;  %p3063_p7 = scmp.lt.u32.totalorder %s3061_s9, %s3056_s30 }
  0x73   : > { %p3065_p0 = scmp.lt.u32.totalorder %s3056_s30, %s3557_s13 }
  0x74   : > { %p3059_p10 = pnand %p3569_p6, %p3057_p2  ;;  %p3064_p9 = por %p3063_p7, %p3062_p5 }
  0x76   : > { %p3060_p3 = pneg %p3059_p10  ;;  %p3066_p12 = por %p3065_p0, %p3064_p9 }
  0x78   : > { %p3067_p4 = pnand %p3066_p12, %p3060_p3 }
  0x7a   : > { %3070 = shalt.err (!%p3067_p4)
}
  0x7b   : > { %s3071_s18 = scalar_lea.vmem %s3561_s4, 512  ;;  %s3304_s21 = smov [#allocation5]  }
  0x7c   : > { %p3072_p2 = scmp.ne.s32.totalorder %s3561_s4, %s3071_s18  ;;  %s3076_s11 = sshll.u32 %s3304_s21, 4  ;;  %s3077_s11 = int_to_ptr.vmem [resolvable:$false] %s3076_s11 }
  0x7d   : > { %s3078_s8 = scalar_lea.vmem %s3077_s11, 1024  ;;  %p3079_p11 = scmp.lt.s32.totalorder %s3561_s4, %s3077_s11 }
  0x7e   : > { %p3074_p10 = pnand %p3072_p2, %p3569_p6  ;;  %p3080_p13 = scmp.lt.s32.totalorder %s3078_s8, %s3071_s18 }
  0x80   : > { %p3075_p8 = pneg %p3074_p10  ;;  %p3081_p5 = por %p3080_p13, %p3079_p11 }
  0x82   : > { %p3082_p7 = pnand %p3081_p5, %p3075_p8 }
  0x84   : > { %3085 = shalt.err (!%p3082_p7)
}
  0x85   : > { %s3968_s9 = smov 128   ;;  %s3306_s30 = smov 8  }
  0x86   : > { %2808 = dma.hbm_to_vmem [thread:$0]  (!%p3542_p1), %s3557_s13, 512, %s3561_s4, %s3563_s10, %s3968_s9, %s3968_s9, %s3306_s30  }
  0x87   : > { %s4007_s20 = sshll.u32 %s3292_s25, 9  ;;  %s4008_s8 = sshll.u32 %s3540_s28, 5 }
  0x88   : > { %s3601_s11 = scalar_lea.hbm %s3927_s2, %s4007_s20  ;;  %s3605_s1 = scalar_lea.vmem [#allocation7], %s4008_s8 }
  0x89   : > { %s583_s7 = sshll.u32 %s3605_s1, 4  ;;  %s3307_s23 = smov [#allocation10]   ;;  %s3659_s7 = int_to_ptr.vmem [resolvable:$true] %s583_s7 }
  0x8a   : > { %s470_s26 = sshll.u32 %s3307_s23, 4  ;;  %s3308_s17 = smov [#allocation13]   ;;  %s471_s26 = int_to_ptr.vmem [resolvable:$true] %s470_s26 }
  0x8b   : > { %s508_s3 = sshll.u32 %s3308_s17, 4  ;;  %s3086_s4 = scalar_lea.hbm %s3931_s6, 1024  ;;  %s509_s3 = int_to_ptr.vmem [resolvable:$true] %s508_s3 }
  0x8c   : > { %p3087_p4 = scmp.ne.s32.totalorder %s3931_s6, %s3086_s4  ;;  %p4009_p8 = scmp.ne.s32.totalorder %s3997_s14, 0 }
  0x8d   : > { %p3093_p12 = scmp.lt.u32.totalorder %s3086_s4, %s3931_s6 }
  0x8e   : > { %p3089_p11 = pnand %p3087_p4, %p4009_p8 }
  0x90   : > { %p3090_p13 = pneg %p3089_p11 }
  0x92   : > { %p3095_p3 = pnand %p3093_p12, %p3090_p13 }
  0x94   : > { %3098 = shalt.err (!%p3095_p3)
}
  0x95   : > { %s3099_s23 = scalar_lea.vmem %s471_s26, 1024  ;;  %p3107_p10 = scmp.lt.s32.totalorder %s471_s26, %s471_s26 }
  0x96   : > { %p3100_p9 = scmp.ne.s32.totalorder %s471_s26, %s3099_s23  ;;  %p3108_p5 = scmp.lt.s32.totalorder %s3099_s23, %s3099_s23 }
  0x98   : > { %p3102_p0 = pnand %p3100_p9, %p4009_p8  ;;  %p3109_p7 = por %p3108_p5, %p3107_p10 }
  0x9a   : > { %p3103_p2 = pneg %p3102_p0 }
  0x9c   : > { %p3110_p1 = pnand %p3109_p7, %p3103_p2 }
  0x9e   : > { %3113 = shalt.err (!%p3110_p1)
}
  0x9f   : > { %p4010_p4 = scmp.ne.s32.totalorder %s3995_s19, 0  ;;  %s4011_s5 = smov 4  }
  0xa0   : > { %s4012_s24 = smov 64   ;;  %s3114_s4 = scalar_lea.hbm %s3937_s12, 4096 }
  0xa1   : > { %2795 = dma.hbm_to_vmem [thread:$0]  (!%p4010_p4), %s3931_s6, 1024, %s471_s26, [#allocation9], %s4012_s24, %s4012_s24, %s4011_s5  }
  0xa2   : > { %p3115_p11 = scmp.ne.s32.totalorder %s3937_s12, %s3114_s4  ;;  %p3121_p12 = scmp.lt.u32.totalorder %s3114_s4, %s3937_s12 }
  0xa4   : > { %p3117_p1 = pnand %p3115_p11, %p4009_p8 }
  0xa6   : > { %p3118_p13 = pneg %p3117_p1 }
  0xa8   : > { %p3123_p3 = pnand %p3121_p12, %p3118_p13 }
  0xaa   : > { %3126 = shalt.err (!%p3123_p3)
}
  0xab   : > { %s3127_s17 = scalar_lea.vmem %s509_s3, 4096  ;;  %p3135_p10 = scmp.lt.s32.totalorder %s509_s3, %s509_s3 }
  0xac   : > { %p3128_p9 = scmp.ne.s32.totalorder %s509_s3, %s3127_s17  ;;  %p3136_p5 = scmp.lt.s32.totalorder %s3127_s17, %s3127_s17 }
  0xae   : > { %p3130_p0 = pnand %p3128_p9, %p4009_p8  ;;  %p3137_p7 = por %p3136_p5, %p3135_p10 }
  0xb0   : > { %p3131_p2 = pneg %p3130_p0 }
  0xb2   : > { %p3138_p6 = pnand %p3137_p7, %p3131_p2 }
  0xb4   : > { %3141 = shalt.err (!%p3138_p6)
}
  0xb5   : > { %2801 = dma.hbm_to_vmem [thread:$0]  (!%p4010_p4), %s3937_s12, 4096, %s509_s3, [#allocation12], %s4012_s24, %s4012_s24, %s4011_s5  }
  0xb6   : > { %s2468_s14 = sshll.u32 %s3540_s28, 3  ;;  %s2469_s18 = sshll.u32 %s3292_s25, 7 }
  0xb7   : > { %s4013_s13 = sld [smem:[#allocation28_spill]]  ;;  %s535_s19 = scalar_lea.vmem [#allocation2], %s2468_s14 }
  0xb8   : > { %s543_s21 = sshll.u32 %s535_s19, 4  ;;  %s532_s23 = scalar_lea.sflag [#allocation3], %s3540_s28  ;;  %s544_s21 = int_to_ptr.vmem [resolvable:$true] %s543_s21 }
  0xb9   : > { %p4014_p8 = scmp.ne.s32.totalorder %s4006_s16, 0 }
  0xbd   : > { %s3655_s20 = scalar_lea.hbm %s4013_s13, %s2469_s18  ;;  %s3147_s24 = scalar_lea.hbm %s4013_s13, 256 }
  0xbe   : > { %s3142_s17 = scalar_lea.hbm %s3655_s20, 128  ;;  %p3148_p1 = scmp.lt.u32.totalorder %s3655_s20, %s4013_s13 }
  0xbf   : > { %p3143_p6 = scmp.ne.s32.totalorder %s3655_s20, %s3142_s17  ;;  %p3149_p13 = scmp.lt.u32.totalorder %s3147_s24, %s3142_s17 }
  0xc0   : > { %p3151_p3 = scmp.lt.u32.totalorder %s3142_s17, %s3655_s20 }
  0xc1   : > { %p3145_p4 = pnand %p3143_p6, %p4014_p8  ;;  %p3150_p12 = por %p3149_p13, %p3148_p1 }
  0xc3   : > { %p3146_p11 = pneg %p3145_p4  ;;  %p3152_p9 = por %p3151_p3, %p3150_p12 }
  0xc5   : > { %p3153_p0 = pnand %p3152_p9, %p3146_p11 }
  0xc7   : > { %3156 = shalt.err (!%p3153_p0)
}
  0xc8   : > { %s3157_s28 = scalar_lea.vmem %s544_s21, 128  ;;  %s3309_s9 = smov [#allocation2]  }
  0xc9   : > { %p3158_p2 = scmp.ne.s32.totalorder %s544_s21, %s3157_s28  ;;  %s3162_s14 = sshll.u32 %s3309_s9, 4  ;;  %s3163_s14 = int_to_ptr.vmem [resolvable:$false] %s3162_s14 }
  0xca   : > { %s3164_s18 = scalar_lea.vmem %s3163_s14, 256  ;;  %p3165_p7 = scmp.lt.s32.totalorder %s544_s21, %s3163_s14 }
  0xcb   : > { %p3160_p10 = pnand %p3158_p2, %p4014_p8  ;;  %p3166_p6 = scmp.lt.s32.totalorder %s3164_s18, %s3157_s28 }
  0xcd   : > { %p3161_p5 = pneg %p3160_p10  ;;  %p3167_p4 = por %p3166_p6, %p3165_p7 }
  0xcf   : > { %p3168_p1 = pnand %p3167_p4, %p3161_p5 }
  0xd1   : > { %3171 = shalt.err (!%p3168_p1)
}
  0xd2   : > { %p4015_p13 = scmp.ne.s32.totalorder %s4003_s15, 0  ;;  %s3172_s8 = scalar_lea.hbm %s3601_s11, 512 }
  0xd3   : > { %p3173_p11 = scmp.ne.s32.totalorder %s3601_s11, %s3172_s8  ;;  %s3177_s17 = scalar_lea.hbm %s3927_s2, 1024 }
  0xd4   : > { %2805 = dma.hbm_to_vmem [thread:$0]  (!%p4015_p13), %s3655_s20, 128, %s544_s21, %s532_s23  }
  0xd5   : > { %p3175_p12 = pnand %p3173_p11, %p4014_p8  ;;  %p3178_p9 = scmp.lt.u32.totalorder %s3601_s11, %s3927_s2 }
  0xd6   : > { %p3179_p0 = scmp.lt.u32.totalorder %s3177_s17, %s3172_s8  ;;  %p3181_p10 = scmp.lt.u32.totalorder %s3172_s8, %s3601_s11 }
  0xd7   : > { %p3176_p3 = pneg %p3175_p12 }
  0xd8   : > { %p3180_p2 = por %p3179_p0, %p3178_p9 }
  0xda   : > { %p3182_p5 = por %p3181_p10, %p3180_p2 }
  0xdc   : > { %p3183_p7 = pnand %p3182_p5, %p3176_p3 }
  0xde   : > { %3186 = shalt.err (!%p3183_p7)
}
  0xdf   : > { %s3187_s20 = scalar_lea.vmem %s3659_s7, 512  ;;  %s3310_s21 = smov [#allocation7]  }
  0xe0   : > { %p3188_p6 = scmp.ne.s32.totalorder %s3659_s7, %s3187_s20  ;;  %s3192_s23 = sshll.u32 %s3310_s21, 4  ;;  %s3193_s23 = int_to_ptr.vmem [resolvable:$false] %s3192_s23 }
  0xe1   : > { %s3194_s24 = scalar_lea.vmem %s3193_s23, 1024  ;;  %p3195_p11 = scmp.lt.s32.totalorder %s3659_s7, %s3193_s23 }
  0xe2   : > { %p3190_p4 = pnand %p3188_p6, %p4014_p8  ;;  %p3196_p12 = scmp.lt.s32.totalorder %s3194_s24, %s3187_s20 }
  0xe4   : > { %p3191_p1 = pneg %p3190_p4  ;;  %p3197_p9 = por %p3196_p12, %p3195_p11 }
  0xe6   : > { %p3198_p0 = pnand %p3197_p9, %p3191_p1 }
  0xe8   : > { %3201 = shalt.err (!%p3198_p0)
}
  0xe9   : > { %s4016_s1 = smov 128   ;;  %p4017_p8 = scmp.ne.s32.totalorder %s3994_s0, 0 }
  0xea   : > { %2811 = dma.hbm_to_vmem [thread:$0]  (!%p4015_p13), %s3601_s11, 512, %s3659_s7, %s3563_s10, %s4016_s1, %s4016_s1, %s3306_s30  }
  0xeb   : > { %601 = sbr.rel (%p4017_p8) target bundleno = 2593 (0xa21), region = 84  ;;  %s3707_s16 = sand.u32 (!%p4017_p8), 1, %s3280_s22  }
  0xec   : > { %s2477_s26 = sshll.u32 (!%p4017_p8), %s3707_s16, 3  ;;  %s604_s28 = scalar_lea.sflag (!%p4017_p8), [#allocation3], %s3707_s16 }
  0xed   : > { %s3713_s15 = scalar_lea.vmem (!%p4017_p8), [#allocation2], %s2477_s26  ;;  %p4018_p3 = scmp.ne.s32.totalorder (!%p4017_p8), %s3991_s29, 0 }
  0xf2   : > { %3255 = dma.done.wait (%p4018_p3), %s604_s28, 128  }
  0xf3   : > { %3257 = vsyncadd (%p4018_p3), %s604_s28, 4294967168  ;;  %s612_s10 = sand.u32 1, %s3432_s27   ;;  %s2478_s0 = sshll.u32 %s3707_s16, 5 }
  0xf4   : > { %s613_s7 = scalar_lea.sflag [#allocation6], %s612_s10  ;;  %s616_s30 = scalar_lea.vmem [#allocation5], %s2478_s0 }
  0xf5   : > { %3259 = dma.done.wait (%p4018_p3), %s613_s7, 1024  }
  0xf6   : > { %3261 = vsyncadd (%p4018_p3), %s613_s7, 4294966272  ;;  %s625_s11 = scalar_lea.vmem [#allocation7], %s2478_s0  ;;  %p4019_p13 = scmp.eq.s32.totalorder %s3432_s27, 0 }
  0xf8   : > { %3263 = dma.done.wait (%p4019_p13), [#allocation9], 1280   ;;  %p4020_p2 = pmov %p4019_p13 }
  0xfa   : > { %3265 = vsyncadd (%p4020_p2), [#allocation9], 4294966016  ;;  %p4021_p10 = pmov %p4020_p2 }
  0xfb   : > { %p4022_p5 = pmov %p4020_p2 }
  0xfc   : > { %3267 = dma.done.wait (%p4021_p10), [#allocation12], 8192  }
  0xfd   : > { %3269 = vsyncadd (%p4022_p5), [#allocation12], 4294959104  ;;  %s4023_s18 = sld [smem:[#allocation32_spill]]  ;;  %v2889_v1 = vld [vmem:[#allocation8] sm:$0xff]   ;;  %v713_v4 = vld [vmem:[%s625_s11 + $0x8] sm:$0xff]  ;;  %vm737_vm0 = vcmask 261120   ;;  %v879_v41 = vlaneseq }
  0xfe   : > { %2669 = vmatprep.subr.bf16.mxu0 %v2889_v1  ;;  %v712_v3 = vld [vmem:[%s625_s11] sm:$0xff]  ;;  %v2891_v6 = vld [vmem:[#allocation8 + $0x8] sm:$0xff]   ;;  %v714_v7 = vld [vmem:[%s625_s11 + $0x10] sm:$0xff]  ;;  %v3311_v16 = vmov 0.0   ;;  %vm3312_vm1 = vmmov 0   ;;  %s4024_s27 = sld [smem:[#allocation22_spill]] }
  0xff   : > { %2670 = vmatpush3.bf16.msra.mxu0 %v2889_v1  ;;  %v797_v5 = vpack.c.bf16 %v713_v4, %v712_v3  ;;  %v715_v8 = vld [vmem:[%s625_s11 + $0x18] sm:$0xff]  ;;  %v708_v9 = vld [vmem:[%s616_s30] sm:$0xff]  ;;  %v709_v10 = vld [vmem:[%s616_s30 + $0x8] sm:$0xff]  ;;  %s4025_s3 = sld [smem:[#allocation30_spill]]  ;;  %v3786_v43 = vshrl.u32 %v879_v41, 7  ;;  %vm1068_vm3 = vcmask 64512  }
 0x100   : > { %2671 = vmatprep.subr.bf16.mxu0 %v2891_v6  ;;  %v798_v11 = vpack.c.bf16 %v715_v8, %v714_v7  ;;  %v719_v12 = vpack.c.bf16 %v709_v10, %v708_v9  ;;  %v710_v13 = vld [vmem:[%s616_s30 + $0x10] sm:$0xff]  ;;  %v711_v14 = vld [vmem:[%s616_s30 + $0x18] sm:$0xff]  ;;  %s3313_s20 = smov 96   ;;  %vm1123_vm4 = vcmask 1043456   ;;  %s4026_s24 = sld [smem:[#allocation33_spill]] }
 0x101   : > { %2681 = vmatprep.mubr.msk.bf16.mxu1 %vm737_vm0, %v797_v5  ;;  %v720_v15 = vpack.c.bf16 %v711_v14, %v710_v13  ;;  %v881_v44 = vsub.s32 0, %v3786_v43  ;;  %s4028_s7 = sld [smem:[#allocation35_spill]]  ;;  %s4029_s9 = sld [smem:[#allocation37_spill]] }
 0x102   : > { %2673 = vmatprep.mubr.msk.bf16.mxu0 %vm737_vm0, %v719_v12  ;;  %s4030_s8 = sld [smem:[#allocation38_spill]]  ;;  %s4033_s21 = sld [smem:[#allocation40_spill]] }
 0x103   : > { %v2888_v0 = vld [vmem:[%s4023_s18] sm:$0xff]   ;;  %v2890_v2 = vld [vmem:[%s4023_s18 + $0x8] sm:$0xff]   ;;  %2672 = vmatpush3.bf16.msra.mxu0 %v2891_v6  ;;  %s4034_s10 = sld [smem:[#allocation41_spill]] }
 0x104   : > { %2677 = vmatprep.subr.bf16.mxu1 %v2888_v0  ;;  %2685 = vmatprep.subr.bf16.mxu0 %v3311_v16  ;;  %p703_p7 = scmp.lt.s32.totalorder %s4024_s27, 1  ;;  %s2584_s23 = sshll.u32 %s4024_s27, 7 }
 0x105   : > { %2678 = vmatpush3.bf16.msra.mxu1 %v2888_v0 }
 0x106   : > { %2679 = vmatprep.subr.bf16.mxu1 %v2890_v2  ;;  %2674 = vmatmul.mubr.msk.bf16.vlgmr.msra.gmra.mrb[0].mxu0 %vm737_vm0, %v720_v15  ;;  %s704_s4 = scalar_select %p703_p7, %s4024_s27, 1 }
 0x107   : > { %2687 = vmatprep.mubr.msk.bf16.mxu0 %vm3312_vm1, %v3311_v16 }
 0x108   : > { %s705_s5 = scalar_lea.vmem %s4025_s3, %s704_s4  ;;  %s4031_s4 = sld [smem:[#allocation26_spill]] }
 0x109   : > { %2680 = vmatpush3.bf16.msra.mxu1 %v2890_v2  ;;  %v716_v42 = vld [vmem:[%s705_s5] sm:$0x1]  ;;  %s4032_s3 = sld [smem:[#allocation39_spill]]  ;;  %s3876_s0 = scalar_lea.hbm %s4034_s10, %s2584_s23 }
 0x10a   : > { %2691 = vmatprep.subr.bf16.mxu1 %v3311_v16  ;;  %vm717_vm2 = vcmp.eq.s32.totalorder %v716_v42, 0 }
 0x10b   : > { %v718_v45 = vsel %vm717_vm2, -1e+20, %v3311_v16 }
 0x10c   : > { %2682 = vmatmul.mubr.msk.bf16.vlgmr.msra.gmra.mrb[0].mxu1 %vm737_vm0, %v798_v11  ;;  %v882_v46 = vrot.slane %v718_v45, %v881_v44 }
 0x10d   : > { %2693 = vmatprep.mubr.msk.bf16.mxu1 %vm3312_vm1, %v3311_v16 }
 0x10e   : > { %p4035_p4 = scmp.ne.s32.totalorder %s4031_s4, 0 }
 0x1d9   : > { %v2675_v19 = vpop.f32.mrb[0].mxu0 }
 0x1da   : > { %v778_v22 = vpop.f32.mrb[1].mxu0  ;;  %v795_v37 = vmul.f32 0.088388346, %v2675_v19 }
 0x1db   : > { %v2676_v24 = vpop.f32.mrb[2].mxu0  ;;  %v793_v27 = vmul.f32 0.088388346, %v778_v22 }
 0x1dc   : > { %v781_v28 = vpop.f32.mrb[3].mxu0  ;;  %v796_v38 = vmul.f32 0.088388346, %v2676_v24  ;;  %v872_v39 = vpack.c.bf16 %v795_v37, %v795_v37 }
 0x1dd   : > { %v870_v31 = vpack.c.bf16 %v793_v27, %v793_v27  ;;  %v794_v32 = vmul.f32 0.088388346, %v781_v28 }
 0x1de   : > { %v873_v40 = vpack.c.bf16 %v796_v38, %v796_v38 }
 0x1df   : > { %v2683_v17 = vpop.f32.mrb[0].mxu1  ;;  %v871_v35 = vpack.c.bf16 %v794_v32, %v794_v32 }
 0x1e0   : > { %v855_v18 = vpop.f32.mrb[1].mxu1  ;;  %v3758_v30 = vpack.c.bf16 %v2683_v17, %v2683_v17 }
 0x1e1   : > { %v3749_v20 = vpack.c.bf16 %v855_v18, %v855_v18  ;;  %v2684_v21 = vpop.f32.mrb[2].mxu1 }
 0x1e2   : > { %v858_v23 = vpop.f32.mrb[3].mxu1  ;;  %v3761_v33 = vpack.c.bf16 %v2684_v21, %v2684_v21  ;;  %v980_v34 = vsel %vm737_vm0, %v3758_v30, 0 }
 0x1e3   : > { %v888_v25 = vsel %vm737_vm0, %v3749_v20, 0  ;;  %v3753_v26 = vpack.c.bf16 %v858_v23, %v858_v23 }
 0x1e4   : > { %2686 = vmatpush3.bf16.xpose.msra.mxu0 %v888_v25  ;;  %v1026_v36 = vsel %vm737_vm0, %v3761_v33, 0 }
 0x1e5   : > { %v934_v29 = vsel %vm737_vm0, %v3753_v26, 0  ;;  %2697 = vmatprep.subr.bf16.mxu0 %v3311_v16 }
 0x1e6   : > { %2692 = vmatpush3.bf16.xpose.msra.mxu1 %v934_v29 }
 0x1e7   : > { %2703 = vmatprep.subr.bf16.mxu1 %v3311_v16 }
 0x1eb   : > { %2688 = vmatmul.mubr.msk.bf16.vlgmr.msra.gmra.mrb[4].mxu0 %vm737_vm0, %v870_v31 }
 0x1ec   : > { %2698 = vmatpush3.bf16.xpose.msra.mxu0 %v980_v34  ;;  %2699 = vmatprep.mubr.msk.bf16.mxu0 %vm3312_vm1, %v3311_v16 }
 0x1ed   : > { %2694 = vmatmul.mubr.msk.bf16.vlgmr.msra.gmra.mrb[4].mxu1 %vm737_vm0, %v871_v35  ;;  %2709 = vmatprep.subr.bf16.mxu0 %v3311_v16 }
 0x1ee   : > { %2704 = vmatpush3.bf16.xpose.msra.mxu1 %v1026_v36  ;;  %2705 = vmatprep.mubr.msk.bf16.mxu1 %vm3312_vm1, %v3311_v16 }
 0x1ef   : > { %2715 = vmatprep.subr.bf16.mxu1 %v3311_v16 }
 0x1f3   : > { %2700 = vmatmul.mubr.msk.bf16.vlgmr.msra.gmra.mrb[8].mxu0 %vm737_vm0, %v872_v39 }
 0x1f4   : > { %2711 = vmatprep.mubr.msk.bf16.mxu0 %vm3312_vm1, %v3311_v16 }
 0x1f5   : > { %2706 = vmatmul.mubr.msk.bf16.vlgmr.msra.gmra.mrb[8].mxu1 %vm737_vm0, %v873_v40 }
 0x1f6   : > { %2717 = vmatprep.mubr.msk.bf16.mxu1 %vm3312_vm1, %v3311_v16 }
 0x2be   : > { %v924_v47 = vpop.f32.mrb[4].mxu0 }
 0x2bf   : > { %v925_v48 = vadd.f32 %v924_v47, %v882_v46  ;;  %v2689_v49 = vpop.f32.mrb[5].mxu0 }
 0x2c0   : > { %v927_v50 = vpop.f32.mrb[6].mxu0  ;;  %v970_v51 = vpop.f32.mrb[4].mxu1 }
 0x2c1   : > { %v971_v52 = vadd.f32 %v970_v51, %v882_v46  ;;  %v2690_v53 = vpop.f32.mrb[7].mxu0  ;;  %v2695_v54 = vpop.f32.mrb[5].mxu1  ;;  %v1069_v55 = vsel %vm1068_vm3, %v925_v48, -inf }
 0x2c2   : > { %1070 = vmax.xlane.f32.xlu0 %v1069_v55  ;;  %v973_v56 = vpop.f32.mrb[6].mxu1  ;;  %v2892_v54 = vld [vmem:[#allocation10] sm:$0xff]  }
 0x2c3   : > { %v2696_v57 = vpop.f32.mrb[7].mxu1  ;;  %v1072_v58 = vsel %vm1068_vm3, %v971_v52, -inf  ;;  %v2894_v56 = vld [vmem:[#allocation10 + $0x8] sm:$0xff]  }
 0x2c4   : > { %v2895_v57 = vld [vmem:[#allocation10 + $0x18] sm:$0xff]  }
 0x2c6   : > { %v1016_v59 = vpop.f32.mrb[8].mxu0  ;;  %1073 = vmax.xlane.f32.xlu0 %v1072_v58 }
 0x2c7   : > { %v1017_v60 = vadd.f32 %v1016_v59, %v882_v46  ;;  %v2701_v61 = vpop.f32.mrb[9].mxu0  ;;  %v2898_v59 = vld [vmem:[#allocation10 + $0x30] sm:$0xff]  }
 0x2c8   : > { %v1019_v62 = vpop.f32.mrb[10].mxu0  ;;  %v1062_v63 = vpop.f32.mrb[8].mxu1 }
 0x2c9   : > { %v1063_v0 = vadd.f32 %v1062_v63, %v882_v46  ;;  %v2702_v1 = vpop.f32.mrb[11].mxu0  ;;  %v2707_v2 = vpop.f32.mrb[9].mxu1  ;;  %v1075_v3 = vsel %vm1068_vm3, %v1017_v60, -inf }
 0x2ca   : > { %1076 = vmax.xlane.f32.xlu1 %v1075_v3  ;;  %v1065_v4 = vpop.f32.mrb[10].mxu1  ;;  %v2896_v1 = vld [vmem:[#allocation10 + $0x20] sm:$0xff]  }
 0x2cb   : > { %v2708_v5 = vpop.f32.mrb[11].mxu1  ;;  %v1078_v6 = vsel %vm1068_vm3, %v1063_v0, -inf  ;;  %v2899_v4 = vld [vmem:[#allocation10 + $0x38] sm:$0xff]  }
 0x2ce   : > { %1079 = vmax.xlane.f32.xlu1 %v1078_v6 }
 0x34f   : > { %v1071_v7 = vpop.xlane.xlu0 %1070 }
 0x350   : > { %v1081_v8 = vsub.f32 %v925_v48, %v1071_v7  ;;  %v2893_v48 = vld [vmem:[#allocation10 + $0x10] sm:$0xff]   ;;  %v2897_v7 = vld [vmem:[#allocation10 + $0x28] sm:$0xff]  }
 0x352   : > { %v1085_v9 = vmul.f32 1.442695, %v1081_v8 }
 0x353   : > { %v1074_v10 = vpop.xlane.xlu0 %1073 }
 0x354   : > { %2980 = vpow2.f32 %v1085_v9  ;;  %v1082_v11 = vsub.f32 %v971_v52, %v1074_v10 }
 0x356   : > { %v1087_v12 = vmul.f32 1.442695, %v1082_v11 }
 0x357   : > { %v1077_v13 = vpop.xlane.xlu1 %1076 }
 0x358   : > { %2982 = vpow2.f32 %v1087_v12  ;;  %v1083_v14 = vsub.f32 %v1017_v60, %v1077_v13 }
 0x35a   : > { %v1089_v15 = vmul.f32 1.442695, %v1083_v14 }
 0x35b   : > { %v1080_v24 = vpop.xlane.xlu1 %1079 }
 0x35c   : > { %2984 = vpow2.f32 %v1089_v15  ;;  %v1084_v25 = vsub.f32 %v1063_v0, %v1080_v24 }
 0x35e   : > { %v2981_v17 = vpop.eup %2980  ;;  %v1091_v27 = vmul.f32 1.442695, %v1084_v25 }
 0x35f   : > { %v1093_v18 = vsel %vm1068_vm3, %v2981_v17, 0.0 }
 0x360   : > { %1094 = vadd.xlane.f32.xlu0 %v1093_v18  ;;  %2986 = vpow2.f32 %v1091_v27 }
 0x362   : > { %v2983_v19 = vpop.eup %2982 }
 0x363   : > { %v1096_v21 = vsel %vm1068_vm3, %v2983_v19, 0.0 }
 0x364   : > { %1097 = vadd.xlane.f32.xlu1 %v1096_v21 }
 0x366   : > { %v2985_v22 = vpop.eup %2984 }
 0x367   : > { %v1099_v23 = vsel %vm1068_vm3, %v2985_v22, 0.0 }
 0x368   : > { %1100 = vadd.xlane.f32.xlu0 %v1099_v23 }
 0x36a   : > { %v2987_v28 = vpop.eup %2986 }
 0x36b   : > { %v1102_v29 = vsel %vm1068_vm3, %v2987_v28, 0.0 }
 0x375   : > { %1168 = vrot.lane.b32.xlu1 %v3753_v26, %s3313_s20 }
 0x379   : > { %1217 = vrot.lane.b32.xlu1 %v3758_v30, %s3313_s20 }
 0x37e   : > { %1118 = vrot.lane.b32.xlu0 %v3749_v20, %s3313_s20 }
 0x39d   : > { %1103 = vadd.xlane.f32.xlu1 %v1102_v29 }
 0x3ae   : > { %1266 = vrot.lane.b32.xlu1 %v3761_v33, %s3313_s20 }
 0x3ed   : > { %v1095_v31 = vpop.xlane.xlu0 %1094 }
 0x3ee   : > { %2988 = vrcp.f32 %v1095_v31 }
 0x3f1   : > { %v1098_v32 = vpop.xlane.xlu1 %1097 }
 0x3f2   : > { %2990 = vrcp.f32 %v1098_v32 }
 0x3f5   : > { %v1101_v26 = vpop.xlane.xlu0 %1100  ;;  %v1169_v34 = vpop.permute.xlu1 %1168 }
 0x3f6   : > { %2992 = vrcp.f32 %v1101_v26  ;;  %v1174_v20 = vsel %vm1123_vm4, %v1169_v34, 0 }
 0x3f7   : > { %2716 = vmatpush3.bf16.msra.mxu1 %v1174_v20 }
 0x3f8   : > { %v2989_v30 = vpop.eup %2988  ;;  %2727 = vmatprep.subr.bf16.mxu1 %v3311_v16 }
 0x3f9   : > { %v1106_v35 = vmul.f32 %v2989_v30, %v2981_v17  ;;  %v1119_v36 = vpop.permute.xlu0 %1118  ;;  %v1218_v38 = vpop.permute.xlu1 %1217  ;;  %v2513_v30 = vld [vmem:[%s4026_s24] ss:$0 sm:$0xff]  ;;  %s702_s24 = scalar_lea.vmem [#allocation14], %s2477_s26  ;;  %s3315_s26 = smov [#allocation14]  }
 0x3fa   : > { %v1125_v37 = vsel %vm1123_vm4, %v1119_v36, 0  ;;  %v1223_v41 = vsel %vm1123_vm4, %v1218_v38, 0  ;;  %v707_v38 = vld [vmem:[%s3713_s15] sm:$0xff]  ;;  %s4027_s15 = sld [smem:[#allocation34_spill]]  ;;  %s2288_s1 = sshll.u32 %s702_s24, 4  ;;  %s3878_s1 = int_to_ptr.vmem [resolvable:$true] %s2288_s1 }
 0x3fb   : > { %2710 = vmatpush3.bf16.msra.mxu0 %v1125_v37  ;;  %v1113_v33 = vpack.c.bf16 %v1106_v35, %v1106_v35  ;;  %s3202_s30 = scalar_lea.vmem %s3878_s1, 128  ;;  %s3206_s27 = sshll.u32 %s3315_s26, 4  ;;  %s3207_s27 = int_to_ptr.vmem [resolvable:$false] %s3206_s27 }
 0x3fc   : > { %v2991_v39 = vpop.eup %2990  ;;  %2721 = vmatprep.subr.bf16.mxu0 %v3311_v16  ;;  %p3203_p6 = scmp.ne.s32.totalorder %s3878_s1, %s3202_s30  ;;  %s3208_s11 = scalar_lea.vmem %s3207_s27, 256 }
 0x3fd   : > { %v1108_v40 = vmul.f32 %v2991_v39, %v2983_v19  ;;  %p3209_p12 = scmp.lt.s32.totalorder %s3878_s1, %s3207_s27  ;;  %p3210_p9 = scmp.lt.s32.totalorder %s3208_s11, %s3202_s30 }
 0x3fe   : > { %2712 = vmatmul.mubr.msk.bf16.vlgmr.msra.gmra.mrb[12].mxu0 %vm1068_vm3, %v1113_v33  ;;  %p3204_p1 = pnand %p3203_p6, %p4035_p4 }
 0x3ff   : > { %2722 = vmatpush3.bf16.msra.mxu0 %v1223_v41  ;;  %v1114_v42 = vpack.c.bf16 %v1108_v40, %v1108_v40  ;;  %2723 = vmatprep.mubr.msk.bf16.mxu0 %vm3312_vm1, %v3311_v16  ;;  %v2900_v41 = vld [vmem:[#allocation11] ss:$16 sps:$4 sm:$0xff]   ;;  %p3211_p0 = por %p3210_p9, %p3209_p12 }
 0x400   : > { %v2993_v45 = vpop.eup %2992  ;;  %2733 = vmatprep.subr.bf16.mxu0 %v3311_v16  ;;  %p3205_p11 = pneg %p3204_p1 }
 0x401   : > { %v1110_v46 = vmul.f32 %v2993_v45, %v2985_v22  ;;  %2718 = vmatmul.mubr.msk.bf16.vlgmr.msra.gmra.mrb[12].mxu1 %vm1068_vm3, %v1114_v42  ;;  %v2902_v42 = vld [vmem:[#allocation11 + $0x4] ss:$16 sps:$4 sm:$0xff]   ;;  %v2903_v45 = vld [vmem:[#allocation11 + $0x8] ss:$16 sps:$4 sm:$0xff]  }
 0x402   : > { %2729 = vmatprep.mubr.msk.bf16.mxu1 %vm3312_vm1, %v3311_v16  ;;  %p3212_p8 = pnand %p3211_p0, %p3205_p11 }
 0x403   : > { %v1115_v47 = vpack.c.bf16 %v1110_v46, %v1110_v46  ;;  %v2905_v46 = vld [vmem:[#allocation11 + $0xc] ss:$16 sps:$4 sm:$0xff]  }
 0x406   : > { %2724 = vmatmul.mubr.msk.bf16.vlgmr.msra.gmra.mrb[16].mxu0 %vm1068_vm3, %v1115_v47  ;;  %v2908_v47 = vld [vmem:[#allocation11 + $0x24] ss:$16 sps:$4 sm:$0xff]  }
 0x407   : > { %2734 = vmatpush3.bf16.msra.mxu0 %v2893_v48  ;;  %2737 = vmatprep.mubr.msk.bf16.mxu0 %vm3312_vm1, %v3311_v16  ;;  %v2911_v48 = vld [vmem:[#allocation11 + $0x2c] ss:$16 sps:$4 sm:$0xff]  }
 0x408   : > { %2735 = vmatprep.subr.bf16.mxu0 %v3311_v16 }
 0x40b   : > { %2736 = vmatpush3.bf16.msra.mxu0 %v2895_v57 }
 0x40c   : > { %2749 = vmatprep.subr.bf16.mxu0 %v3311_v16 }
 0x42a   : > { %v1104_v49 = vpop.xlane.xlu1 %1103 }
 0x42b   : > { %2994 = vrcp.f32 %v1104_v49  ;;  %v2906_v49 = vld [vmem:[#allocation11 + $0x20] ss:$16 sps:$4 sm:$0xff]  }
 0x42e   : > { %v1267_v50 = vpop.permute.xlu1 %1266 }
 0x42f   : > { %v1272_v51 = vsel %vm1123_vm4, %v1267_v50, 0  ;;  %v2909_v50 = vld [vmem:[#allocation11 + $0x28] ss:$16 sps:$4 sm:$0xff]  }
 0x430   : > { %2728 = vmatpush3.bf16.msra.mxu1 %v1272_v51  ;;  %v2914_v51 = vld [vmem:[#allocation11 + $0x44] ss:$16 sps:$4 sm:$0xff]  }
 0x431   : > { %2741 = vmatprep.subr.bf16.mxu1 %v3311_v16 }
 0x435   : > { %v2995_v52 = vpop.eup %2994 }
 0x436   : > { %v1112_v53 = vmul.f32 %v2995_v52, %v2987_v28  ;;  %v2917_v52 = vld [vmem:[#allocation11 + $0x4c] ss:$16 sps:$4 sm:$0xff]  }
 0x438   : > { %v1116_v55 = vpack.c.bf16 %v1112_v53, %v1112_v53  ;;  %v2912_v53 = vld [vmem:[#allocation11 + $0x40] ss:$16 sps:$4 sm:$0xff]  }
 0x43a   : > { %2730 = vmatmul.mubr.msk.bf16.vlgmr.msra.gmra.mrb[16].mxu1 %vm1068_vm3, %v1116_v55 }
 0x43b   : > { %2742 = vmatpush3.bf16.msra.mxu1 %v2892_v54  ;;  %2745 = vmatprep.mubr.msk.bf16.mxu1 %vm3312_vm1, %v3311_v16  ;;  %v2915_v54 = vld [vmem:[#allocation11 + $0x48] ss:$16 sps:$4 sm:$0xff]  }
 0x43c   : > { %2743 = vmatprep.subr.bf16.mxu1 %v3311_v16 }
 0x43f   : > { %2744 = vmatpush3.bf16.msra.mxu1 %v2894_v56 }
 0x440   : > { %2757 = vmatprep.subr.bf16.mxu1 %v3311_v16 }
 0x4d1   : > { %v1161_v58 = vpop.f32.mrb[12].mxu0 }
 0x4d2   : > { %v1314_v60 = vpack.c.bf16 %v1161_v58, %v1161_v58  ;;  %v2713_v61 = vpop.f32.mrb[13].mxu0 }
 0x4d3   : > { %v1164_v62 = vpop.f32.mrb[14].mxu0  ;;  %v2918_v61 = vld [vmem:[#allocation11 + $0x60] ss:$16 sps:$4 sm:$0xff]  }
 0x4d4   : > { %v2714_v63 = vpop.f32.mrb[15].mxu0  ;;  %v1210_v0 = vpop.f32.mrb[12].mxu1  ;;  %2746 = vmatmul.mubr.msk.bf16.vlgmr.msra.gmra.mrb[20].mxu1 %vm737_vm0, %v1314_v60  ;;  %v2923_v60 = vld [vmem:[#allocation11 + $0x6c] ss:$16 sps:$4 sm:$0xff]   ;;  %v2921_v62 = vld [vmem:[#allocation11 + $0x68] ss:$16 sps:$4 sm:$0xff]  }
 0x4d5   : > { %v1319_v2 = vpack.c.bf16 %v1210_v0, %v1210_v0  ;;  %v2719_v3 = vpop.f32.mrb[13].mxu1  ;;  %2758 = vmatpush3.bf16.msra.mxu1 %v2898_v59  ;;  %2761 = vmatprep.mubr.msk.bf16.mxu1 %vm3312_vm1, %v3311_v16  ;;  %v2920_v59 = vld [vmem:[#allocation11 + $0x64] ss:$16 sps:$4 sm:$0xff]   ;;  %v2929_v0 = vld [vmem:[#allocation11 + $0x8c] ss:$16 sps:$4 sm:$0xff]  }
 0x4d6   : > { %v1213_v5 = vpop.f32.mrb[14].mxu1  ;;  %2759 = vmatprep.subr.bf16.mxu1 %v3311_v16  ;;  %v2926_v63 = vld [vmem:[#allocation11 + $0x84] ss:$16 sps:$4 sm:$0xff]  }
 0x4d7   : > { %v2720_v6 = vpop.f32.mrb[15].mxu1  ;;  %2738 = vmatmul.mubr.msk.bf16.vlgmr.msra.gmra.mrb[20].mxu0 %vm737_vm0, %v1319_v2  ;;  %v2927_v2 = vld [vmem:[#allocation11 + $0x88] ss:$16 sps:$4 sm:$0xff]   ;;  %v2932_v3 = vld [vmem:[#allocation11 + $0xa4] ss:$16 sps:$4 sm:$0xff]  }
 0x4d8   : > { %2750 = vmatpush3.bf16.msra.mxu0 %v2896_v1  ;;  %2753 = vmatprep.mubr.msk.bf16.mxu0 %vm3312_vm1, %v3311_v16  ;;  %v2924_v1 = vld [vmem:[#allocation11 + $0x80] ss:$16 sps:$4 sm:$0xff]   ;;  %v2933_v6 = vld [vmem:[#allocation11 + $0xa8] ss:$16 sps:$4 sm:$0xff]  }
 0x4d9   : > { %v1259_v8 = vpop.f32.mrb[16].mxu0  ;;  %2751 = vmatprep.subr.bf16.mxu0 %v3311_v16  ;;  %2760 = vmatpush3.bf16.msra.mxu1 %v2899_v4  ;;  %v2935_v4 = vld [vmem:[#allocation11 + $0xac] ss:$16 sps:$4 sm:$0xff]   ;;  %v2930_v5 = vld [vmem:[#allocation11 + $0xa0] ss:$16 sps:$4 sm:$0xff]  }
 0x4da   : > { %v2725_v9 = vpop.f32.mrb[17].mxu0  ;;  %v1435_v12 = vpack.c.bf16 %v1259_v8, %v1259_v8  ;;  %1852 = vmatprep.subr.bf16.mxu1 %v2905_v46  ;;  %v2941_v8 = vld [vmem:[#allocation11 + $0xcc] ss:$16 sps:$4 sm:$0xff]   ;;  %v2966_v46 = vld [vmem:[#allocation13 + $0x20] sm:$0xff]  }
 0x4db   : > { %v1262_v10 = vpop.f32.mrb[18].mxu0  ;;  %v2936_v9 = vld [vmem:[#allocation11 + $0xc0] ss:$16 sps:$4 sm:$0xff]  }
 0x4dc   : > { %v2726_v11 = vpop.f32.mrb[19].mxu0  ;;  %2752 = vmatpush3.bf16.msra.mxu0 %v2897_v7  ;;  %v2938_v7 = vld [vmem:[#allocation11 + $0xc4] ss:$16 sps:$4 sm:$0xff]   ;;  %v2939_v10 = vld [vmem:[#allocation11 + $0xc8] ss:$16 sps:$4 sm:$0xff]  }
 0x4dd   : > { %1811 = vmatprep.subr.bf16.mxu0 %v2902_v42  ;;  %v2942_v11 = vld [vmem:[#allocation11 + $0xe0] ss:$16 sps:$4 sm:$0xff]  }
 0x4de   : > { %v2964_v42 = vld [vmem:[#allocation13 + $0x60] sm:$0xff]  }
 0x4df   : > { %2754 = vmatmul.mubr.msk.bf16.vlgmr.msra.gmra.mrb[24].mxu0 %vm737_vm0, %v1435_v12  ;;  %v2944_v12 = vld [vmem:[#allocation11 + $0xe4] ss:$16 sps:$4 sm:$0xff]  }
 0x4e0   : > { %1812 = vmatpush1.bf16.msra.mxu0 %v2900_v41  ;;  %v2963_v41 = vld [vmem:[#allocation13 + $0x98] sm:$0xff]  }
 0x4e1   : > { %1813 = vmatprep.subr.bf16.mxu0 %v2908_v47  ;;  %v2967_v47 = vld [vmem:[#allocation13 + $0xa0] sm:$0xff]  }
 0x4e4   : > { %1814 = vmatpush1.bf16.msra.mxu0 %v2906_v49  ;;  %v2969_v49 = vld [vmem:[#allocation13 + $0xe8] sm:$0xff]  }
 0x4e5   : > { %1815 = vmatprep.subr.bf16.mxu0 %v2914_v51  ;;  %v2971_v51 = vld [vmem:[#allocation13 + $0xa8] sm:$0xff]  }
 0x4e8   : > { %1816 = vmatpush1.bf16.msra.mxu0 %v2912_v53  ;;  %v2973_v53 = vld [vmem:[#allocation13 + $0xf0] sm:$0xff]  }
 0x4e9   : > { %1817 = vmatprep.subr.bf16.mxu0 %v2920_v59  ;;  %v2979_v59 = vld [vmem:[#allocation13 + $0xb8] sm:$0xff]  }
 0x4ec   : > { %1818 = vmatpush1.bf16.msra.mxu0 %v2918_v61  ;;  %v1629_v61 = vld [vmem:[%s4029_s9] sm:$0xf] }
 0x4ed   : > { %1819 = vmatprep.subr.bf16.mxu0 %v2926_v63  ;;  %v1645_v63 = vsub.s32 3, %v3786_v43 }
 0x4f0   : > { %1820 = vmatpush1.bf16.msra.mxu0 %v2924_v1 }
 0x4f1   : > { %1821 = vmatprep.subr.bf16.mxu0 %v2932_v3  ;;  %v1646_v3 = vrot.slane %v1629_v61, %v1645_v63 }
 0x4f4   : > { %1822 = vmatpush1.bf16.msra.mxu0 %v2930_v5 }
 0x4f5   : > { %1823 = vmatprep.subr.bf16.mxu0 %v2938_v7 }
 0x4f8   : > { %1824 = vmatpush1.bf16.msra.mxu0 %v2936_v9 }
 0x4f9   : > { %1825 = vmatprep.subr.bf16.mxu0 %v2944_v12 }
 0x4fc   : > { %1826 = vmatpush1.bf16.msra.mxu0 %v2942_v11 }
 0x50d   : > { %v1308_v13 = vpop.f32.mrb[16].mxu1 }
 0x50e   : > { %v1497_v14 = vpack.c.bf16 %v1308_v13, %v1308_v13  ;;  %v2731_v15 = vpop.f32.mrb[17].mxu1  ;;  %v2945_v13 = vld [vmem:[#allocation11 + $0xe8] ss:$16 sps:$4 sm:$0xff]  }
 0x50f   : > { %v1311_v17 = vpop.f32.mrb[18].mxu1  ;;  %v3314_v15 = vmov 0  }
 0x510   : > { %v2732_v18 = vpop.f32.mrb[19].mxu1  ;;  %2762 = vmatmul.mubr.msk.bf16.vlgmr.msra.gmra.mrb[24].mxu1 %vm737_vm0, %v1497_v14  ;;  %v2947_v14 = vld [vmem:[#allocation11 + $0xec] ss:$16 sps:$4 sm:$0xff]   ;;  %1843 = vmatprep.mubr.bf16.mxu0 %v3314_v15  ;;  %v2948_v17 = vld [vmem:[#allocation13 + $0x40] sm:$0xff]  }
 0x511   : > { %1853 = vmatpush1.bf16.msra.mxu1 %v2903_v45  ;;  %1884 = vmatprep.mubr.bf16.mxu1 %v3314_v15  ;;  %v2949_v18 = vld [vmem:[#allocation13 + $0xc0] sm:$0xff]  }
 0x512   : > { %1854 = vmatprep.subr.bf16.mxu1 %v2911_v48  ;;  %2625 = vmatprep.subr.bf16.mxu0 %v2948_v17  ;;  %v2965_v45 = vld [vmem:[#allocation13 + $0xe0] sm:$0xff]   ;;  %v2968_v48 = vld [vmem:[#allocation13 + $0x68] sm:$0xff]  }
 0x515   : > { %1855 = vmatpush1.bf16.msra.mxu1 %v2909_v50  ;;  %v2970_v50 = vld [vmem:[#allocation13 + $0x28] sm:$0xff]  }
 0x516   : > { %1856 = vmatprep.subr.bf16.mxu1 %v2917_v52  ;;  %v2972_v52 = vld [vmem:[#allocation13 + $0x70] sm:$0xff]  }
 0x519   : > { %1857 = vmatpush1.bf16.msra.mxu1 %v2915_v54  ;;  %v2974_v54 = vld [vmem:[#allocation13 + $0x30] sm:$0xff]  }
 0x51a   : > { %1858 = vmatprep.subr.bf16.mxu1 %v2923_v60  ;;  %v1641_v60 = vsub.s32 2, %v3786_v43 }
 0x51c   : > { %v1642_v1 = vrot.slane %v1629_v61, %v1641_v60 }
 0x51d   : > { %1859 = vmatpush1.bf16.msra.mxu1 %v2921_v62  ;;  %v1637_v62 = vsub.s32 1, %v3786_v43 }
 0x51e   : > { %1860 = vmatprep.subr.bf16.mxu1 %v2929_v0  ;;  %v1634_v0 = vrot.slane %v1629_v61, %v881_v44 }
 0x521   : > { %1861 = vmatpush1.bf16.msra.mxu1 %v2927_v2  ;;  %v1638_v2 = vrot.slane %v1629_v61, %v1637_v62 }
 0x522   : > { %1862 = vmatprep.subr.bf16.mxu1 %v2935_v4 }
 0x525   : > { %1863 = vmatpush1.bf16.msra.mxu1 %v2933_v6 }
 0x526   : > { %1864 = vmatprep.subr.bf16.mxu1 %v2941_v8 }
 0x529   : > { %1865 = vmatpush1.bf16.msra.mxu1 %v2939_v10 }
 0x52a   : > { %1866 = vmatprep.subr.bf16.mxu1 %v2947_v14 }
 0x52d   : > { %1867 = vmatpush1.bf16.msra.mxu1 %v2945_v13 }
 0x52e   : > { %2647 = vmatprep.subr.bf16.mxu1 %v2949_v18 }
 0x5a7   : > { %v1429_v19 = vpop.f32.mrb[20].mxu1 }
 0x5a8   : > { %v2747_v21 = vpop.f32.mrb[21].mxu1 }
 0x5a9   : > { %v1432_v22 = vpop.f32.mrb[22].mxu1 }
 0x5aa   : > { %v1374_v23 = vpop.f32.mrb[20].mxu0  ;;  %v2748_v16 = vpop.f32.mrb[23].mxu1 }
 0x5ab   : > { %v1430_v24 = vadd.f32 %v1429_v19, %v1374_v23  ;;  %v2739_v25 = vpop.f32.mrb[21].mxu0  ;;  %v2514_v16 = vld [vmem:[%s4027_s15] ss:$0 sm:$0xff] }
 0x5ac   : > { %v1377_v27 = vpop.f32.mrb[22].mxu0  ;;  %v2515_v25 = vld [vmem:[%s4028_s7] ss:$0 sm:$0xff]  ;;  %s2274_s7 = scalar_lea.sflag [#allocation4], %s3707_s16 }
 0x5ad   : > { %v2740_v28 = vpop.f32.mrb[23].mxu0 }
 0x5b2   : > { %v1490_v29 = vpop.f32.mrb[24].mxu0 }
 0x5b3   : > { %v1496_v31 = vadd.f32 %v1490_v29, %v1430_v24  ;;  %v2755_v32 = vpop.f32.mrb[25].mxu0  ;;  %v2950_v29 = vld [vmem:[#allocation13] sm:$0xff]  }
 0x5b4   : > { %v1493_v26 = vpop.f32.mrb[26].mxu0 }
 0x5b5   : > { %v2756_v34 = vpop.f32.mrb[27].mxu0  ;;  %v2952_v26 = vld [vmem:[#allocation13 + $0x48] sm:$0xff]  }
 0x5b6   : > { %v2953_v34 = vld [vmem:[#allocation13 + $0xc8] sm:$0xff]  }
 0x5e3   : > { %v1552_v20 = vpop.f32.mrb[24].mxu1 }
 0x5e4   : > { %v1558_v35 = vadd.f32 %v1552_v20, %v1496_v31  ;;  %v2763_v36 = vpop.f32.mrb[25].mxu1  ;;  %v2951_v31 = vld [vmem:[#allocation13 + $0x80] sm:$0xff]   ;;  %v2954_v20 = vld [vmem:[#allocation13 + $0x8] sm:$0xff]  }
 0x5e5   : > { %v1555_v37 = vpop.f32.mrb[26].mxu1  ;;  %v2957_v36 = vld [vmem:[#allocation13 + $0xd0] sm:$0xff]  }
 0x5e6   : > { %v1566_v33 = vadd.f32 %v2513_v30, %v1558_v35  ;;  %v2764_v39 = vpop.f32.mrb[27].mxu1  ;;  %v2955_v30 = vld [vmem:[#allocation13 + $0x88] sm:$0xff]   ;;  %v2956_v35 = vld [vmem:[#allocation13 + $0x50] sm:$0xff]  }
 0x5e7   : > { %v2958_v37 = vld [vmem:[#allocation13 + $0x10] sm:$0xff]   ;;  %v2961_v39 = vld [vmem:[#allocation13 + $0xd8] sm:$0xff]  }
 0x5e8   : > { %v1567_v40 = vadd.f32 %v1566_v33, %v707_v38  ;;  %v2959_v38 = vld [vmem:[#allocation13 + $0x90] sm:$0xff]   ;;  %v2960_v33 = vld [vmem:[#allocation13 + $0x58] sm:$0xff]  }
 0x5ea   : > { %1570 = vadd.xlane.f32.xlu0 %v1567_v40 }
 0x677   : > { %v1571_v55 = vpop.xlane.xlu0 %1570 }
 0x678   : > { %v1573_v56 = vmul.f32 0.0078125, %v1571_v55  ;;  %v2975_v55 = vld [vmem:[#allocation13 + $0xb0] sm:$0xff]  }
 0x67a   : > { %v1574_v57 = vsub.f32 %v1567_v40, %v1573_v56  ;;  %v2962_v40 = vld [vmem:[#allocation13 + $0x18] sm:$0xff]  }
 0x67b   : > { %v2976_v56 = vld [vmem:[#allocation13 + $0x78] sm:$0xff]  }
 0x67c   : > { %v1575_v58 = vmul.f32 %v1574_v57, %v1574_v57 }
 0x67e   : > { %1576 = vadd.xlane.f32.xlu1 %v1575_v58  ;;  %v2978_v58 = vld [vmem:[#allocation13 + $0x38] sm:$0xff]  }
 0x70b   : > { %v1577_v19 = vpop.xlane.xlu1 %1576 }
 0x70c   : > { %v1578_v21 = vmul.f32 0.0078125, %v1577_v19 }
 0x70e   : > { %v1579_v22 = vadd.f32 1e-05, %v1578_v21 }
 0x710   : > { %2996 = vrsqrt.f32 %v1579_v22 }
 0x71a   : > { %v2997_v23 = vpop.eup %2996 }
 0x71b   : > { %v1581_v24 = vmul.f32 %v2997_v23, %v1574_v57  ;;  %v2977_v57 = vld [vmem:[#allocation13 + $0xf8] sm:$0xff]  }
 0x71d   : > { %v1588_v27 = vmul.f32 %v2514_v16, %v1581_v24 }
 0x71f   : > { %v3848_v28 = vadd.f32 %v2515_v25, %v1588_v27  ;;  %v2548_v25 = vld [vmem:[%s4030_s8] ss:$0 sm:$0xff] }
 0x721   : > { %v1596_v32 = vpack.c.bf16 %v3848_v28, %v3848_v28 }
 0x723   : > { %1844 = vmatmul.mubr.bf16.vlgmr.msra.gmra.mrb[28].mxu0 %v1596_v32  ;;  %1885 = vmatmul.mubr.bf16.vlgmr.msra.gmra.mrb[28].mxu1 %v1596_v32 }
 0x724   : > { %2626 = vmatpush3.bf16.msra.mxu0 %v2950_v29  ;;  %2648 = vmatpush3.bf16.msra.mxu1 %v2951_v31 }
 0x725   : > { %2627 = vmatprep.subr.bf16.mxu0 %v2952_v26  ;;  %2649 = vmatprep.subr.bf16.mxu1 %v2953_v34 }
 0x728   : > { %2628 = vmatpush3.bf16.msra.mxu0 %v2954_v20  ;;  %2650 = vmatpush3.bf16.msra.mxu1 %v2955_v30 }
 0x729   : > { %2629 = vmatprep.subr.bf16.mxu0 %v2956_v35  ;;  %2651 = vmatprep.subr.bf16.mxu1 %v2957_v36 }
 0x72c   : > { %2630 = vmatpush3.bf16.msra.mxu0 %v2958_v37  ;;  %2652 = vmatpush3.bf16.msra.mxu1 %v2959_v38 }
 0x72d   : > { %2631 = vmatprep.subr.bf16.mxu0 %v2960_v33  ;;  %2653 = vmatprep.subr.bf16.mxu1 %v2961_v39 }
 0x730   : > { %2632 = vmatpush3.bf16.msra.mxu0 %v2962_v40  ;;  %2654 = vmatpush3.bf16.msra.mxu1 %v2963_v41 }
 0x731   : > { %2633 = vmatprep.subr.bf16.mxu0 %v2964_v42  ;;  %2655 = vmatprep.subr.bf16.mxu1 %v2965_v45 }
 0x734   : > { %2634 = vmatpush3.bf16.msra.mxu0 %v2966_v46  ;;  %2656 = vmatpush3.bf16.msra.mxu1 %v2967_v47  ;;  %v2581_v47 = vld [vmem:[%s4032_s3] ss:$0 sm:$0xff] }
 0x735   : > { %2635 = vmatprep.subr.bf16.mxu0 %v2968_v48  ;;  %2657 = vmatprep.subr.bf16.mxu1 %v2969_v49 }
 0x738   : > { %2636 = vmatpush3.bf16.msra.mxu0 %v2970_v50  ;;  %2658 = vmatpush3.bf16.msra.mxu1 %v2971_v51 }
 0x739   : > { %2637 = vmatprep.subr.bf16.mxu0 %v2972_v52  ;;  %2659 = vmatprep.subr.bf16.mxu1 %v2973_v53 }
 0x73c   : > { %2638 = vmatpush3.bf16.msra.mxu0 %v2974_v54  ;;  %2660 = vmatpush3.bf16.msra.mxu1 %v2975_v55 }
 0x73d   : > { %2639 = vmatprep.subr.bf16.mxu0 %v2976_v56  ;;  %2661 = vmatprep.subr.bf16.mxu1 %v2977_v57 }
 0x740   : > { %2640 = vmatpush3.bf16.msra.mxu0 %v2978_v58  ;;  %2662 = vmatpush3.bf16.msra.mxu1 %v2979_v59 }
 0x7f6   : > { %v1845_v4 = vpop.f32.mrb[28].mxu0  ;;  %v1886_v5 = vpop.f32.mrb[28].mxu1 }
 0x7f7   : > { %v1846_v6 = vadd.f32 %v1845_v4, %v1634_v0  ;;  %v1887_v7 = vadd.f32 %v1886_v5, %v1642_v1  ;;  %v1847_v8 = vpop.f32.mrb[29].mxu0  ;;  %v1888_v9 = vpop.f32.mrb[29].mxu1 }
 0x7f8   : > { %v1848_v10 = vadd.f32 %v1847_v8, %v1638_v2  ;;  %v1889_v11 = vadd.f32 %v1888_v9, %v1646_v3  ;;  %v1849_v12 = vpop.f32.mrb[30].mxu0  ;;  %v1890_v13 = vpop.f32.mrb[30].mxu1 }
 0x7f9   : > { %v1893_v14 = vmax.f32 %v1846_v6, 0.0  ;;  %v1895_v15 = vmax.f32 %v1887_v7, 0.0  ;;  %v1850_v17 = vpop.f32.mrb[31].mxu0  ;;  %v1891_v18 = vpop.f32.mrb[31].mxu1 }
 0x7fa   : > { %v1894_v19 = vmax.f32 %v1848_v10, 0.0  ;;  %v1896_v43 = vmax.f32 %v1889_v11, 0.0 }
 0x7fb   : > { %v1897_v22 = vpack.c.bf16 %v1893_v14, %v1893_v14  ;;  %v1899_v23 = vpack.c.bf16 %v1895_v15, %v1895_v15 }
 0x7fc   : > { %v1898_v44 = vpack.c.bf16 %v1894_v19, %v1894_v19  ;;  %v1900_v21 = vpack.c.bf16 %v1896_v43, %v1896_v43 }
 0x7fe   : > { %2196 = vmatprep.mubr.bf16.mxu0 %v1898_v44  ;;  %2236 = vmatprep.mubr.bf16.mxu1 %v1900_v21 }
 0x7ff   : > { %2197 = vmatmul.mubr.bf16.vlgmr.msra.gmra.mrb[32].mxu0 %v1897_v22  ;;  %2237 = vmatmul.mubr.bf16.vlgmr.msra.gmra.mrb[32].mxu1 %v1899_v23 }
 0x8d2   : > { %v2641_v16 = vpop.f32.mrb[32].mxu0  ;;  %v2663_v24 = vpop.f32.mrb[32].mxu1 }
 0x8d3   : > { %v2642_v27 = vpop.f32.mrb[33].mxu0  ;;  %v2664_v29 = vpop.f32.mrb[33].mxu1 }
 0x8d4   : > { %v2643_v31 = vadd.f32 %v2642_v27, %v2641_v16  ;;  %v2665_v32 = vadd.f32 %v2664_v29, %v2663_v24  ;;  %v2644_v26 = vpop.f32.mrb[34].mxu0  ;;  %v2666_v34 = vpop.f32.mrb[34].mxu1 }
 0x8d5   : > { %v2645_v20 = vpop.f32.mrb[35].mxu0  ;;  %v2667_v30 = vpop.f32.mrb[35].mxu1 }
 0x8d6   : > { %v2199_v35 = vadd.f32 %v2643_v31, %v2548_v25 }
 0x8d8   : > { %v2239_v36 = vadd.f32 %v2665_v32, %v2199_v35 }
 0x8da   : > { %v2244_v37 = vadd.f32 %v2239_v36, %v3848_v28  ;;  %v2582_v28 = vld [vmem:[%s4033_s21] ss:$0 sm:$0xff] }
 0x8dc   : > { %2247 = vadd.xlane.f32.xlu0 %v2244_v37 }
 0x969   : > { %v2248_v38 = vpop.xlane.xlu0 %2247 }
 0x96a   : > { %v2249_v33 = vmul.f32 0.0078125, %v2248_v38 }
 0x96c   : > { %v2250_v39 = vsub.f32 %v2244_v37, %v2249_v33 }
 0x96e   : > { %v2251_v40 = vmul.f32 %v2250_v39, %v2250_v39 }
 0x970   : > { %2252 = vadd.xlane.f32.xlu0 %v2251_v40 }
 0x9fd   : > { %v2253_v41 = vpop.xlane.xlu0 %2252 }
 0x9fe   : > { %v2254_v42 = vmul.f32 0.0078125, %v2253_v41 }
 0xa00   : > { %v2255_v45 = vadd.f32 1e-05, %v2254_v42 }
 0xa02   : > { %2998 = vrsqrt.f32 %v2255_v45 }
 0xa0c   : > { %v2999_v46 = vpop.eup %2998 }
 0xa0d   : > { %v2257_v48 = vmul.f32 %v2999_v46, %v2250_v39 }
 0xa0f   : > { %v2264_v49 = vmul.f32 %v2581_v47, %v2257_v48 }
 0xa11   : > { %v2271_v50 = vadd.f32 %v2582_v28, %v2264_v49 }
 0xa13   : > { %2272 = vst [vmem:[%s702_s24] sm:$0xff] %v2271_v50 }
 0xa14   : > { %3215 = shalt.err (!%p3212_p8)
}
 0xa15   : > { %s3216_s16 = scalar_lea.hbm %s3876_s0, 128  ;;  %s3220_s29 = scalar_lea.hbm %s4034_s10, 256 }
 0xa16   : > { %p3217_p3 = scmp.ne.s32.totalorder %s3876_s0, %s3216_s16  ;;  %p3221_p10 = scmp.lt.u32.totalorder %s3876_s0, %s4034_s10 }
 0xa17   : > { %p3222_p5 = scmp.lt.u32.totalorder %s3220_s29, %s3216_s16  ;;  %p3224_p6 = scmp.lt.u32.totalorder %s3216_s16, %s3876_s0 }
 0xa18   : > { %p3218_p13 = pnand %p3217_p3, %p4035_p4 }
 0xa19   : > { %p3223_p7 = por %p3222_p5, %p3221_p10 }
 0xa1a   : > { %p3219_p2 = pneg %p3218_p13 }
 0xa1b   : > { %p3225_p1 = por %p3224_p6, %p3223_p7 }
 0xa1d   : > { %p3226_p11 = pnand %p3225_p1, %p3219_p2 }
 0xa1f   : > { %3229 = shalt.err (!%p3226_p11)
}
 0xa20   : > { %2787 = dma.vmem_to_hbm [thread:$0]  (%p4035_p4), %s3878_s1, 128, %s3876_s0, %s2274_s7  }
 0xa21 PF: > { %s4036_s17 = sld [smem:[#allocation20_spill]]  ;;  %s4037_s3 = sld [smem:[#allocation24_spill]] }
 0xa22   : > { %s4038_s5 = sld [smem:[#allocation23_spill]] }
 0xa27   : > { %s2300_s20 = sand.u32 1, %s4036_s17   ;;  %p4039_p12 = scmp.ne.s32.totalorder %s4037_s3, 0 }
 0xa28   : > { %p4040_p9 = scmp.ge.s32.totalorder %s4038_s5, 2  ;;  %s2301_s21 = scalar_lea.sflag [#allocation4], %s2300_s20 }
 0xa2a   : > { %p2813_p0 = pnand %p4040_p9, %p4039_p12 }
 0xa2c   : > { %3271 = dma.done.wait (!%p2813_p0), %s2301_s21, 128  }
 0xa2d   : > { %3273 = vsyncadd (!%p2813_p0), %s2301_s21, 4294967168  ;;  %s37_s26 = sadd.s32 1, %s4038_s5   ;;  %s4041_s23 = sld [smem:[#allocation21_spill]] }
 0xa2e   : > { %p34_p8 = scmp.ge.s32.totalorder %s37_s26, 4   ;;  %s4042_s4 = sld [smem:[#allocation27_spill]] }
 0xa2f   : > { %s4043_s28 = sld [smem:[#allocation25_spill]]  ;;  %s4044_s21 = smov %s3280_s22 }
 0xa30   : > { %s4047_s24 = smov %s3292_s25  ;;  %36 = sbr.rel (!%p34_p8) target bundleno = 25 (0x19), region = 175 }
 0xa33   : > { %s4045_s22 = smov %s4041_s23 }
 0xa34   : > { %s4046_s23 = smov %s4042_s4 }
 0xa35   : > { %s4048_s25 = smov %s4043_s28 }
 0xa37   :  { %2306 = vsyncpa [#allocation3], 1 }
 0xa38   :  { %2308 = vsyncpa [#allocation3 + $0x1], 1 }
 0xa39   :  { %2309 = vsyncpa [#allocation6], 1 }
 0xa3a   :  { %2311 = vsyncpa [#allocation6 + $0x1], 1 }
 0xa3b   :  { %2312 = vsyncpa [#allocation9], 1 }
 0xa3c   :  { %2313 = vsyncpa [#allocation12], 1 }
 0xa3d   :  { %2314 = vsyncpa [#allocation4], 1 }
 0xa3e   :  { %2316 = vsyncpa [#allocation4 + $0x1], 1 }

</bundles_post_ra>
